<compile_context>
chip_gen: v7x
topology: tpu7x:2x2x1
jax: 0.10.0
libtpu: 0.0.40
codegen_flags: <defaults>
</compile_context>

<pallas_src>
import functools

import jax
import jax.numpy as jnp
from jax import lax
from jax.experimental import pallas as pl
from jax.experimental.pallas import tpu as pltpu

EPS = 1e-5
DEFAULT_DROPOUT_P = 0.0003
_NUM_PASSES = 3  # 0: BN1 stats, 1: BN2 stats, 2: produce h3


def _round_up(x, m):
    return (x + m - 1) // m * m


def _mlp_kernel(x_ref,
                w1_ref, b1_ref, g1_ref, be1_ref,
                w2_ref, b2_ref, g2_ref, be2_ref,
                w3_ref, b3_ref,
                h3_ref,
                bn1_ref, bn2_ref,
                *, true_b, tile_rows, needs_mask):
    p = pl.program_id(0)              # pass index (0..2)
    i = pl.program_id(1)              # batch-tile index
    last = pl.num_programs(1) - 1

    # ---- zero the BN stat accumulators at the very first grid step -------------------
    @pl.when((p == 0) & (i == 0))
    def _zero():
        bn1_ref[...] = jnp.zeros_like(bn1_ref)
        bn2_ref[...] = jnp.zeros_like(bn2_ref)

    # Rows belonging to the real (unpadded) batch -- only needed if the batch was padded.
    if needs_mask:
        ridx = i * tile_rows + lax.broadcasted_iota(jnp.int32, (tile_rows, 1), 0)
        valid = ridx < true_b
        n_b = jnp.minimum(true_b - i * tile_rows, tile_rows).astype(jnp.float32)
    else:
        valid = None
        n_b = float(tile_rows)
    n_a = (i * tile_rows).astype(jnp.float32)   # valid rows accumulated before this tile

    def welford_update(stat_ref, h):
        # stat_ref rows: [0]=running mean, [1]=running M2 (sum of squared deviations).
        # Chan et al. parallel merge -> avoids E[x^2]-E[x]^2 cancellation at large B.
        hm = h if valid is None else jnp.where(valid, h, 0.0)
        tile_mean = jnp.sum(hm, axis=0, keepdims=True) * (1.0 / n_b)
        d = h - tile_mean
        dsq = d * d
        if valid is not None:
            dsq = jnp.where(valid, dsq, 0.0)
        tile_m2 = jnp.sum(dsq, axis=0, keepdims=True)
        n = n_a + n_b
        delta = tile_mean - stat_ref[0:1, :]
        stat_ref[0:1, :] = stat_ref[0:1, :] + delta * (n_b / n)
        stat_ref[1:2, :] = stat_ref[1:2, :] + tile_m2 + (delta * delta) * (n_a * n_b / n)

    def finalize(stat_ref, g_ref, be_ref):
        # Fold (mean, M2) into BN scale/shift, stored in place of the statistics.
        mean = stat_ref[0:1, :]
        var = jnp.maximum(stat_ref[1:2, :] * (1.0 / float(true_b)), 0.0)  # biased variance
        scale = g_ref[...] * lax.rsqrt(var + EPS)
        stat_ref[1:2, :] = be_ref[...] - scale * mean    # shift
        stat_ref[0:1, :] = scale                         # scale

    # ---- layer_1 + ReLU (K = 3): three rank-1 VPU updates, recomputed every pass ------
    xv = x_ref[...]
    w1 = w1_ref[...]
    h1 = (xv[:, 0:1] * w1[0:1, :] + xv[:, 1:2] * w1[1:2, :]
          + xv[:, 2:3] * w1[2:3, :] + b1_ref[...])
    h1 = jnp.maximum(h1, 0.0)

    @pl.when(p == 0)
    def _bn1_stats():
        welford_update(bn1_ref, h1)

    @pl.when((p == 0) & (i == last))
    def _bn1_done():
        finalize(bn1_ref, g1_ref, be1_ref)

    @pl.when(p >= 1)
    def _passes_12():
        # batchnorm1 as scale/shift, then layer_2 + ReLU (bf16 MXU, f32 accumulation).
        h1n = h1 * bn1_ref[0:1, :] + bn1_ref[1:2, :]
        h2 = jnp.dot(h1n.astype(jnp.bfloat16), w2_ref[...],
                     preferred_element_type=jnp.float32) + b2_ref[...]
        h2 = jnp.maximum(h2, 0.0)

        @pl.when(p == 1)
        def _bn2_stats():
            welford_update(bn2_ref, h2)

        @pl.when(p == 2)
        def _final():
            h2n = h2 * bn2_ref[0:1, :] + bn2_ref[1:2, :]          # batchnorm2
            # layer_3 + ReLU (bf16 MXU, f32 accumulation); h3 is the kernel output.
            h3 = jnp.dot(h2n.astype(jnp.bfloat16), w3_ref[...],
                         preferred_element_type=jnp.float32) + b3_ref[...]
            h3_ref[...] = jnp.maximum(h3, 0.0)

    @pl.when((p == 1) & (i == last))
    def _bn2_done():
        finalize(bn2_ref, g2_ref, be2_ref)


def binary_classification_forward(x, params, *, dropout_p=DEFAULT_DROPOUT_P,
                                  dropout_seed=0, block_rows=1024):
    """Training-mode forward pass of BinaryClassification (batch statistics for BN)."""
    x = jnp.asarray(x, jnp.float32)
    b, feat = x.shape
    assert feat == 3, "BinaryClassification expects 3 input features"

    # Batch tile: multiple of 8 sublanes. At tb=1024 the live f32 set (~8 KiB/row at
    # width 1024) is ~10 MiB, well inside the 48 MiB scoped limit on every generation.
    tb = _round_up(min(int(block_rows), _round_up(b, 8)), 8)
    b_pad = _round_up(b, tb)
    nb = b_pad // tb
    if b_pad != b:
        x = jnp.pad(x, ((0, b_pad - b), (0, 0)))   # padded rows are masked out of BN stats

    kernel = functools.partial(_mlp_kernel, true_b=b, tile_rows=tb,
                               needs_mask=(b_pad != b))

    row = lambda p, i: (i, 0)                               # batch-tiled x
    rep = lambda p, i: (0, 0)                               # VMEM-resident weights/params
    out_map = lambda p, i: (jnp.where(p == 2, i, 0), 0)     # pinned until the final pass

    grid_spec = pltpu.PrefetchScalarGridSpec(
        num_scalar_prefetch=0,
        grid=(_NUM_PASSES, nb),
        in_specs=[
            pl.BlockSpec((tb, 3), row),             # x
            pl.BlockSpec((3, 128), rep),            # w1
            pl.BlockSpec((1, 128), rep),            # b1
            pl.BlockSpec((1, 128), rep),            # gamma1
            pl.BlockSpec((1, 128), rep),            # beta1
            pl.BlockSpec((128, 1024), rep),         # w2 (bf16)
            pl.BlockSpec((1, 1024), rep),           # b2
            pl.BlockSpec((1, 1024), rep),           # gamma2
            pl.BlockSpec((1, 1024), rep),           # beta2
            pl.BlockSpec((1024, 8), rep),           # w3 (bf16)
            pl.BlockSpec((1, 8), rep),              # b3
        ],
        out_specs=pl.BlockSpec((tb, 8), out_map),
        scratch_shapes=[
            pltpu.VMEM((2, 128), jnp.float32),      # BN1: [mean; M2] -> [scale; shift]
            pltpu.VMEM((2, 1024), jnp.float32),     # BN2
        ],
    )

    h3 = pl.pallas_call(
        kernel,
        grid_spec=grid_spec,
        out_shape=jax.ShapeDtypeStruct((b_pad, 8), jnp.float32),
        compiler_params=pltpu.CompilerParams(
            # Both grid axes carry serial dependencies (pass ordering; cross-tile BN sums).
            dimension_semantics=("arbitrary", "arbitrary"),
            vmem_limit_bytes=48 * 1024 * 1024,
        ),
    )(
        x,
        params["w1"], params["b1"], params["g1"], params["be1"],
        params["w2"].astype(jnp.bfloat16), params["b2"], params["g2"], params["be2"],
        params["w3"].astype(jnp.bfloat16), params["b3"],
    )[:b]

    # BatchNorm3 (batch statistics) + dropout + layer_out on the tiny (B, 8) activation.
    mean3 = jnp.mean(h3, axis=0, keepdims=True)
    var3 = jnp.mean((h3 - mean3) ** 2, axis=0, keepdims=True)       # biased variance
    scale3 = params["g3"] * lax.rsqrt(var3 + EPS)
    h3n = h3 * scale3 + (params["be3"] - scale3 * mean3)
    if dropout_p > 0.0:
        keep = jax.random.bernoulli(jax.random.PRNGKey(dropout_seed),
                                    1.0 - float(dropout_p), h3n.shape)
        h3n = jnp.where(keep, h3n / (1.0 - float(dropout_p)), 0.0)
    return jnp.dot(h3n, params["wo"], preferred_element_type=jnp.float32) + params["bo"]


# ------------------------------ reference & init -------------------------------------

def _bn_ref(h, g, be):
    mean = jnp.mean(h, axis=0, keepdims=True)
    var = jnp.mean((h - mean) ** 2, axis=0, keepdims=True)
    scale = g * lax.rsqrt(var + EPS)
    return h * scale + (be - scale * mean)


def reference_forward(x, params):
    """Pure-JAX mirror of the kernel's math (dropout disabled), for self-checking."""
    hp = lax.Precision.HIGHEST
    h1 = jnp.maximum(jnp.dot(x, params["w1"], precision=hp) + params["b1"], 0.0)
    h1 = _bn_ref(h1, params["g1"], params["be1"])
    h2 = jnp.maximum(jnp.dot(h1.astype(jnp.bfloat16), params["w2"].astype(jnp.bfloat16),
                             preferred_element_type=jnp.float32) + params["b2"], 0.0)
    h2 = _bn_ref(h2, params["g2"], params["be2"])
    h3 = jnp.maximum(jnp.dot(h2.astype(jnp.bfloat16), params["w3"].astype(jnp.bfloat16),
                             preferred_element_type=jnp.float32) + params["b3"], 0.0)
    h3 = _bn_ref(h3, params["g3"], params["be3"])
    return jnp.dot(h3, params["wo"], precision=hp) + params["bo"]


def init_params(key):
    """Deterministic parameter init (shapes from BinaryClassification.__init__)."""
    ks = jax.random.split(key, 8)

    def linear(kw, kb, fan_in, fan_out):
        bound = 1.0 / jnp.sqrt(jnp.float32(fan_in))
        # stored as (in, out) == PyTorch (out, in) transposed
        w = jax.random.uniform(kw, (fan_in, fan_out), jnp.float32, -bound, bound)
        b = jax.random.uniform(kb, (1, fan_out), jnp.float32, -bound, bound)
        return w, b

    w1, b1 = linear(ks[0], ks[1], 3, 128)
    w2, b2 = linear(ks[2], ks[3], 128, 1024)
    w3, b3 = linear(ks[4], ks[5], 1024, 8)
    wo, bo = linear(ks[6], ks[7], 8, 1)

    return dict(
        w1=w1, b1=b1, g1=jnp.ones((1, 128), jnp.float32), be1=jnp.zeros((1, 128), jnp.float32),
        w2=w2, b2=b2, g2=jnp.ones((1, 1024), jnp.float32), be2=jnp.zeros((1, 1024), jnp.float32),
        w3=w3, b3=b3, g3=jnp.ones((1, 8), jnp.float32), be3=jnp.zeros((1, 8), jnp.float32),
        wo=wo, bo=bo,
    )


if __name__ == "__main__":
    key = jax.random.PRNGKey(0)
    k_x, k_p, k_x2 = jax.random.split(key, 3)

    params = init_params(k_p)

    # Main demo: small batch, module input shape (batch, 3), training-mode forward.
    batch = 8
    x = jax.random.normal(k_x, (batch, 3), jnp.float32)

    out = binary_classification_forward(x, params)          # dropout active (p=0.0003)
    out = jax.block_until_ready(out)
    assert out.shape == (batch, 1) and out.dtype == jnp.float32
    assert bool(jnp.all(jnp.isfinite(out)))

    # Self-check vs. a pure-JAX reference (dropout disabled so it is deterministic).
    # Second case exercises multi-tile + padded-batch BN statistics (B=20, tile=8 -> 3 tiles).
    x2 = jax.random.normal(k_x2, (20, 3), jnp.float32)
    for xb, brows in ((x, 1024), (x2, 8)):
        got = binary_classification_forward(xb, params, dropout_p=0.0, block_rows=brows)
        got = jax.block_until_ready(got)
        want = reference_forward(xb, params)
        err = float(jnp.max(jnp.abs(got - want)))
        assert err < 3e-2, f"kernel/reference mismatch: max abs err {err}"

    print("KERNEL_OK")
</pallas_src>

<mosaic_0001>
module attributes {stable_mosaic.version = 11 : i64} {
  func.func @_mlp_kernel(%arg0: i32, %arg1: i32, %arg2: memref<8x3xf32, #tpu.memory_space<vmem>>, %arg3: memref<3x128xf32, #tpu.memory_space<vmem>>, %arg4: memref<1x128xf32, #tpu.memory_space<vmem>>, %arg5: memref<1x128xf32, #tpu.memory_space<vmem>>, %arg6: memref<1x128xf32, #tpu.memory_space<vmem>>, %arg7: memref<128x1024xbf16, #tpu.memory_space<vmem>>, %arg8: memref<1x1024xf32, #tpu.memory_space<vmem>>, %arg9: memref<1x1024xf32, #tpu.memory_space<vmem>>, %arg10: memref<1x1024xf32, #tpu.memory_space<vmem>>, %arg11: memref<1024x8xbf16, #tpu.memory_space<vmem>>, %arg12: memref<1x8xf32, #tpu.memory_space<vmem>>, %arg13: memref<8x8xf32, #tpu.memory_space<vmem>>, %arg14: memref<2x128xf32, #tpu.memory_space<vmem>>, %arg15: memref<2x1024xf32, #tpu.memory_space<vmem>>) attributes {dimension_semantics = [#tpu.dimension_semantics<arbitrary>, #tpu.dimension_semantics<arbitrary>], iteration_bounds = array<i64: 3, 1>, scalar_prefetch = 0 : i64, scratch_operands = 2 : i64, tpu.core_type = #tpu.core_type<tc>, window_params = [{transform_indices = @transform_0, window_bounds = array<i64: 8, 3>}, {pipeline_mode = #tpu.pipeline_mode<synchronous>, transform_indices = @transform_1, window_bounds = array<i64: 3, 128>}, {pipeline_mode = #tpu.pipeline_mode<synchronous>, transform_indices = @transform_2, window_bounds = array<i64: 1, 128>}, {pipeline_mode = #tpu.pipeline_mode<synchronous>, transform_indices = @transform_3, window_bounds = array<i64: 1, 128>}, {pipeline_mode = #tpu.pipeline_mode<synchronous>, transform_indices = @transform_4, window_bounds = array<i64: 1, 128>}, {pipeline_mode = #tpu.pipeline_mode<synchronous>, transform_indices = @transform_5, window_bounds = array<i64: 128, 1024>}, {pipeline_mode = #tpu.pipeline_mode<synchronous>, transform_indices = @transform_6, window_bounds = array<i64: 1, 1024>}, {pipeline_mode = #tpu.pipeline_mode<synchronous>, transform_indices = @transform_7, window_bounds = array<i64: 1, 1024>}, {pipeline_mode = #tpu.pipeline_mode<synchronous>, transform_indices = @transform_8, window_bounds = array<i64: 1, 1024>}, {pipeline_mode = #tpu.pipeline_mode<synchronous>, transform_indices = @transform_9, window_bounds = array<i64: 1024, 8>}, {pipeline_mode = #tpu.pipeline_mode<synchronous>, transform_indices = @transform_10, window_bounds = array<i64: 1, 8>}, {transform_indices = @transform_11, window_bounds = array<i64: 8, 8>}]} {
    %c0_i32 = arith.constant 0 : i32
    %0 = arith.cmpi eq, %arg0, %c0_i32 : i32
    %c0_i32_0 = arith.constant 0 : i32
    %1 = arith.cmpi eq, %arg1, %c0_i32_0 : i32
    %2 = arith.andi %0, %1 : i1
    %3 = arith.extui %2 : i1 to i32
    %c0_i32_1 = arith.constant 0 : i32
    %4 = arith.cmpi ne, %3, %c0_i32_1 : i32
    scf.if %4 {
      %cst_16 = arith.constant 0.000000e+00 : f32
      %47 = vector.broadcast %cst_16 : f32 to vector<2x128xf32>
      %c0_17 = arith.constant 0 : index
      %c0_18 = arith.constant 0 : index
      %48 = vector.load %arg14[%c0_17, %c0_18] : memref<2x128xf32, #tpu.memory_space<vmem>>, vector<2x128xf32>
      tpu.vector_store %arg14[%c0_17, %c0_18], %47 {strides = array<i32>} : memref<2x128xf32, #tpu.memory_space<vmem>>, vector<2x128xf32>,
      %cst_19 = arith.constant 0.000000e+00 : f32
      %49 = vector.broadcast %cst_19 : f32 to vector<2x1024xf32>
      %c0_20 = arith.constant 0 : index
      %c0_21 = arith.constant 0 : index
      %50 = vector.load %arg15[%c0_20, %c0_21] : memref<2x1024xf32, #tpu.memory_space<vmem>>, vector<2x1024xf32>
      tpu.vector_store %arg15[%c0_20, %c0_21], %49 {strides = array<i32>} : memref<2x1024xf32, #tpu.memory_space<vmem>>, vector<2x1024xf32>,
    } else {
    }
    %c8_i32 = arith.constant 8 : i32
    %5 = arith.muli %arg1, %c8_i32 : i32
    %6 = arith.sitofp %5 : i32 to f32
    %c0 = arith.constant 0 : index
    %c0_2 = arith.constant 0 : index
    %7 = vector.load %arg2[%c0, %c0_2] : memref<8x3xf32, #tpu.memory_space<vmem>>, vector<8x3xf32>
    %c0_3 = arith.constant 0 : index
    %c0_4 = arith.constant 0 : index
    %8 = vector.load %arg3[%c0_3, %c0_4] : memref<3x128xf32, #tpu.memory_space<vmem>>, vector<3x128xf32>
    %9 = vector.extract_strided_slice %7 {offsets = [0, 0], sizes = [8, 1], strides = [1, 1]} : vector<8x3xf32> to vector<8x1xf32>
    %10 = vector.extract_strided_slice %8 {offsets = [0, 0], sizes = [1, 128], strides = [1, 1]} : vector<3x128xf32> to vector<1x128xf32>
    %11 = vector.broadcast %9 : vector<8x1xf32> to vector<8x128xf32>
    %12 = vector.broadcast %10 : vector<1x128xf32> to vector<8x128xf32>
    %13 = arith.mulf %11, %12 : vector<8x128xf32>
    %14 = vector.extract_strided_slice %7 {offsets = [0, 1], sizes = [8, 1], strides = [1, 1]} : vector<8x3xf32> to vector<8x1xf32>
    %15 = vector.extract_strided_slice %8 {offsets = [1, 0], sizes = [1, 128], strides = [1, 1]} : vector<3x128xf32> to vector<1x128xf32>
    %16 = vector.broadcast %14 : vector<8x1xf32> to vector<8x128xf32>
    %17 = vector.broadcast %15 : vector<1x128xf32> to vector<8x128xf32>
    %18 = arith.mulf %16, %17 : vector<8x128xf32>
    %19 = arith.addf %13, %18 : vector<8x128xf32>
    %20 = vector.extract_strided_slice %7 {offsets = [0, 2], sizes = [8, 1], strides = [1, 1]} : vector<8x3xf32> to vector<8x1xf32>
    %21 = vector.extract_strided_slice %8 {offsets = [2, 0], sizes = [1, 128], strides = [1, 1]} : vector<3x128xf32> to vector<1x128xf32>
    %22 = vector.broadcast %20 : vector<8x1xf32> to vector<8x128xf32>
    %23 = vector.broadcast %21 : vector<1x128xf32> to vector<8x128xf32>
    %24 = arith.mulf %22, %23 : vector<8x128xf32>
    %25 = arith.addf %19, %24 : vector<8x128xf32>
    %c0_5 = arith.constant 0 : index
    %c0_6 = arith.constant 0 : index
    %26 = vector.load %arg4[%c0_5, %c0_6] : memref<1x128xf32, #tpu.memory_space<vmem>>, vector<1x128xf32>
    %27 = vector.broadcast %26 : vector<1x128xf32> to vector<8x128xf32>
    %28 = arith.addf %25, %27 : vector<8x128xf32>
    %cst = arith.constant 0.000000e+00 : f32
    %29 = vector.broadcast %cst : f32 to vector<8x128xf32>
    %30 = arith.maximumf %28, %29 : vector<8x128xf32>
    %c0_i32_7 = arith.constant 0 : i32
    %31 = arith.cmpi eq, %arg0, %c0_i32_7 : i32
    %32 = arith.extui %31 : i1 to i32
    %c0_i32_8 = arith.constant 0 : i32
    %33 = arith.cmpi ne, %32, %c0_i32_8 : i32
    scf.if %33 {
      %cst_16 = arith.constant dense<0.000000e+00> : vector<128xf32>
      %47 = vector.multi_reduction <add>, %30, %cst_16 [0] : vector<8x128xf32> to vector<128xf32>
      %48 = vector.shape_cast %47 : vector<128xf32> to vector<1x128xf32>
      %cst_17 = arith.constant 1.250000e-01 : f32
      %49 = vector.broadcast %cst_17 : f32 to vector<1x128xf32>
      %50 = arith.mulf %48, %49 : vector<1x128xf32>
      %51 = vector.broadcast %50 : vector<1x128xf32> to vector<8x128xf32>
      %52 = arith.subf %30, %51 : vector<8x128xf32>
      %53 = arith.mulf %52, %52 : vector<8x128xf32>
      %cst_18 = arith.constant dense<0.000000e+00> : vector<128xf32>
      %54 = vector.multi_reduction <add>, %53, %cst_18 [0] : vector<8x128xf32> to vector<128xf32>
      %55 = vector.shape_cast %54 : vector<128xf32> to vector<1x128xf32>
      %cst_19 = arith.constant 8.000000e+00 : f32
      %56 = arith.addf %6, %cst_19 : f32
      %c0_20 = arith.constant 0 : index
      %c0_21 = arith.constant 0 : index
      %57 = vector.load %arg14[%c0_20, %c0_21] : memref<2x128xf32, #tpu.memory_space<vmem>>, vector<1x128xf32>
      %58 = arith.subf %50, %57 : vector<1x128xf32>
      %c0_22 = arith.constant 0 : index
      %c0_23 = arith.constant 0 : index
      %59 = vector.load %arg14[%c0_22, %c0_23] : memref<2x128xf32, #tpu.memory_space<vmem>>, vector<1x128xf32>
      %cst_24 = arith.constant 8.000000e+00 : f32
      %60 = arith.divf %cst_24, %56 : f32
      %61 = vector.broadcast %60 : f32 to vector<1x128xf32>
      %62 = arith.mulf %58, %61 : vector<1x128xf32>
      %63 = arith.addf %59, %62 : vector<1x128xf32>
      %c0_25 = arith.constant 0 : index
      %c0_26 = arith.constant 0 : index
      %64 = vector.load %arg14[%c0_25, %c0_26] : memref<2x128xf32, #tpu.memory_space<vmem>>, vector<1x128xf32>
      tpu.vector_store %arg14[%c0_25, %c0_26], %63 {strides = array<i32>} : memref<2x128xf32, #tpu.memory_space<vmem>>, vector<1x128xf32>,
      %c1 = arith.constant 1 : index
      %c0_27 = arith.constant 0 : index
      %65 = vector.load %arg14[%c1, %c0_27] : memref<2x128xf32, #tpu.memory_space<vmem>>, vector<1x128xf32>
      %66 = arith.addf %65, %55 : vector<1x128xf32>
      %67 = arith.mulf %58, %58 : vector<1x128xf32>
      %cst_28 = arith.constant 8.000000e+00 : f32
      %68 = arith.mulf %6, %cst_28 : f32
      %69 = arith.divf %68, %56 : f32
      %70 = vector.broadcast %69 : f32 to vector<1x128xf32>
      %71 = arith.mulf %67, %70 : vector<1x128xf32>
      %72 = arith.addf %66, %71 : vector<1x128xf32>
      %c1_29 = arith.constant 1 : index
      %c0_30 = arith.constant 0 : index
      %73 = vector.load %arg14[%c1_29, %c0_30] : memref<2x128xf32, #tpu.memory_space<vmem>>, vector<1x128xf32>
      tpu.vector_store %arg14[%c1_29, %c0_30], %72 {strides = array<i32>} : memref<2x128xf32, #tpu.memory_space<vmem>>, vector<1x128xf32>,
    } else {
    }
    %c0_i32_9 = arith.constant 0 : i32
    %34 = arith.cmpi eq, %arg0, %c0_i32_9 : i32
    %c0_i32_10 = arith.constant 0 : i32
    %35 = arith.cmpi eq, %arg1, %c0_i32_10 : i32
    %36 = arith.andi %34, %35 : i1
    %37 = arith.extui %36 : i1 to i32
    %c0_i32_11 = arith.constant 0 : i32
    %38 = arith.cmpi ne, %37, %c0_i32_11 : i32
    scf.if %38 {
      %c0_16 = arith.constant 0 : index
      %c0_17 = arith.constant 0 : index
      %47 = vector.load %arg14[%c0_16, %c0_17] : memref<2x128xf32, #tpu.memory_space<vmem>>, vector<1x128xf32>
      %c1 = arith.constant 1 : index
      %c0_18 = arith.constant 0 : index
      %48 = vector.load %arg14[%c1, %c0_18] : memref<2x128xf32, #tpu.memory_space<vmem>>, vector<1x128xf32>
      %cst_19 = arith.constant 1.250000e-01 : f32
      %49 = vector.broadcast %cst_19 : f32 to vector<1x128xf32>
      %50 = arith.mulf %48, %49 : vector<1x128xf32>
      %cst_20 = arith.constant 0.000000e+00 : f32
      %51 = vector.broadcast %cst_20 : f32 to vector<1x128xf32>
      %52 = arith.maximumf %50, %51 : vector<1x128xf32>
      %c0_21 = arith.constant 0 : index
      %c0_22 = arith.constant 0 : index
      %53 = vector.load %arg5[%c0_21, %c0_22] : memref<1x128xf32, #tpu.memory_space<vmem>>, vector<1x128xf32>
      %cst_23 = arith.constant 9.99999974E-6 : f32
      %54 = vector.broadcast %cst_23 : f32 to vector<1x128xf32>
      %55 = arith.addf %52, %54 : vector<1x128xf32>
      %56 = math.rsqrt %55 : vector<1x128xf32>
      %57 = arith.mulf %53, %56 : vector<1x128xf32>
      %c0_24 = arith.constant 0 : index
      %c0_25 = arith.constant 0 : index
      %58 = vector.load %arg6[%c0_24, %c0_25] : memref<1x128xf32, #tpu.memory_space<vmem>>, vector<1x128xf32>
      %59 = arith.mulf %57, %47 : vector<1x128xf32>
      %60 = arith.subf %58, %59 : vector<1x128xf32>
      %c1_26 = arith.constant 1 : index
      %c0_27 = arith.constant 0 : index
      %61 = vector.load %arg14[%c1_26, %c0_27] : memref<2x128xf32, #tpu.memory_space<vmem>>, vector<1x128xf32>
      tpu.vector_store %arg14[%c1_26, %c0_27], %60 {strides = array<i32>} : memref<2x128xf32, #tpu.memory_space<vmem>>, vector<1x128xf32>,
      %c0_28 = arith.constant 0 : index
      %c0_29 = arith.constant 0 : index
      %62 = vector.load %arg14[%c0_28, %c0_29] : memref<2x128xf32, #tpu.memory_space<vmem>>, vector<1x128xf32>
      tpu.vector_store %arg14[%c0_28, %c0_29], %57 {strides = array<i32>} : memref<2x128xf32, #tpu.memory_space<vmem>>, vector<1x128xf32>,
    } else {
    }
    %c1_i32 = arith.constant 1 : i32
    %39 = arith.cmpi sge, %arg0, %c1_i32 : i32
    %40 = arith.extui %39 : i1 to i32
    %c0_i32_12 = arith.constant 0 : i32
    %41 = arith.cmpi ne, %40, %c0_i32_12 : i32
    scf.if %41 {
      %c0_16 = arith.constant 0 : index
      %c0_17 = arith.constant 0 : index
      %47 = vector.load %arg14[%c0_16, %c0_17] : memref<2x128xf32, #tpu.memory_space<vmem>>, vector<1x128xf32>
      %48 = vector.broadcast %47 : vector<1x128xf32> to vector<8x128xf32>
      %49 = arith.mulf %30, %48 : vector<8x128xf32>
      %c1 = arith.constant 1 : index
      %c0_18 = arith.constant 0 : index
      %50 = vector.load %arg14[%c1, %c0_18] : memref<2x128xf32, #tpu.memory_space<vmem>>, vector<1x128xf32>
      %51 = vector.broadcast %50 : vector<1x128xf32> to vector<8x128xf32>
      %52 = arith.addf %49, %51 : vector<8x128xf32>
      %53 = arith.truncf %52 : vector<8x128xf32> to vector<8x128xbf16>
      %c0_19 = arith.constant 0 : index
      %c0_20 = arith.constant 0 : index
      %54 = vector.load %arg7[%c0_19, %c0_20] : memref<128x1024xbf16, #tpu.memory_space<vmem>>, vector<128x1024xbf16>
      %cst_21 = arith.constant dense<0.000000e+00> : vector<8x1024xf32>
      %55 = tpu.matmul %53, %54, %cst_21 {dimension_numbers = #tpu.dot_dimension_numbers<[1], [0], [0], [1], [0, 0, 1, 1], [], []>} : vector<8x128xbf16>, vector<128x1024xbf16>, vector<8x1024xf32> -> vector<8x1024xf32>
      %c0_22 = arith.constant 0 : index
      %c0_23 = arith.constant 0 : index
      %56 = vector.load %arg8[%c0_22, %c0_23] : memref<1x1024xf32, #tpu.memory_space<vmem>>, vector<1x1024xf32>
      %57 = vector.broadcast %56 : vector<1x1024xf32> to vector<8x1024xf32>
      %58 = arith.addf %55, %57 : vector<8x1024xf32>
      %cst_24 = arith.constant 0.000000e+00 : f32
      %59 = vector.broadcast %cst_24 : f32 to vector<8x1024xf32>
      %60 = arith.maximumf %58, %59 : vector<8x1024xf32>
      %c1_i32_25 = arith.constant 1 : i32
      %61 = arith.cmpi eq, %arg0, %c1_i32_25 : i32
      %62 = arith.extui %61 : i1 to i32
      %c0_i32_26 = arith.constant 0 : i32
      %63 = arith.cmpi ne, %62, %c0_i32_26 : i32
      scf.if %63 {
        %cst_28 = arith.constant dense<0.000000e+00> : vector<1024xf32>
        %67 = vector.multi_reduction <add>, %60, %cst_28 [0] : vector<8x1024xf32> to vector<1024xf32>
        %68 = vector.shape_cast %67 : vector<1024xf32> to vector<1x1024xf32>
        %cst_29 = arith.constant 1.250000e-01 : f32
        %69 = vector.broadcast %cst_29 : f32 to vector<1x1024xf32>
        %70 = arith.mulf %68, %69 : vector<1x1024xf32>
        %71 = vector.broadcast %70 : vector<1x1024xf32> to vector<8x1024xf32>
        %72 = arith.subf %60, %71 : vector<8x1024xf32>
        %73 = arith.mulf %72, %72 : vector<8x1024xf32>
        %cst_30 = arith.constant dense<0.000000e+00> : vector<1024xf32>
        %74 = vector.multi_reduction <add>, %73, %cst_30 [0] : vector<8x1024xf32> to vector<1024xf32>
        %75 = vector.shape_cast %74 : vector<1024xf32> to vector<1x1024xf32>
        %cst_31 = arith.constant 8.000000e+00 : f32
        %76 = arith.addf %6, %cst_31 : f32
        %c0_32 = arith.constant 0 : index
        %c0_33 = arith.constant 0 : index
        %77 = vector.load %arg15[%c0_32, %c0_33] : memref<2x1024xf32, #tpu.memory_space<vmem>>, vector<1x1024xf32>
        %78 = arith.subf %70, %77 : vector<1x1024xf32>
        %c0_34 = arith.constant 0 : index
        %c0_35 = arith.constant 0 : index
        %79 = vector.load %arg15[%c0_34, %c0_35] : memref<2x1024xf32, #tpu.memory_space<vmem>>, vector<1x1024xf32>
        %cst_36 = arith.constant 8.000000e+00 : f32
        %80 = arith.divf %cst_36, %76 : f32
        %81 = vector.broadcast %80 : f32 to vector<1x1024xf32>
        %82 = arith.mulf %78, %81 : vector<1x1024xf32>
        %83 = arith.addf %79, %82 : vector<1x1024xf32>
        %c0_37 = arith.constant 0 : index
        %c0_38 = arith.constant 0 : index
        %84 = vector.load %arg15[%c0_37, %c0_38] : memref<2x1024xf32, #tpu.memory_space<vmem>>, vector<1x1024xf32>
        tpu.vector_store %arg15[%c0_37, %c0_38], %83 {strides = array<i32>} : memref<2x1024xf32, #tpu.memory_space<vmem>>, vector<1x1024xf32>,
        %c1_39 = arith.constant 1 : index
        %c0_40 = arith.constant 0 : index
        %85 = vector.load %arg15[%c1_39, %c0_40] : memref<2x1024xf32, #tpu.memory_space<vmem>>, vector<1x1024xf32>
        %86 = arith.addf %85, %75 : vector<1x1024xf32>
        %87 = arith.mulf %78, %78 : vector<1x1024xf32>
        %cst_41 = arith.constant 8.000000e+00 : f32
        %88 = arith.mulf %6, %cst_41 : f32
        %89 = arith.divf %88, %76 : f32
        %90 = vector.broadcast %89 : f32 to vector<1x1024xf32>
        %91 = arith.mulf %87, %90 : vector<1x1024xf32>
        %92 = arith.addf %86, %91 : vector<1x1024xf32>
        %c1_42 = arith.constant 1 : index
        %c0_43 = arith.constant 0 : index
        %93 = vector.load %arg15[%c1_42, %c0_43] : memref<2x1024xf32, #tpu.memory_space<vmem>>, vector<1x1024xf32>
        tpu.vector_store %arg15[%c1_42, %c0_43], %92 {strides = array<i32>} : memref<2x1024xf32, #tpu.memory_space<vmem>>, vector<1x1024xf32>,
      } else {
      }
      %c2_i32 = arith.constant 2 : i32
      %64 = arith.cmpi eq, %arg0, %c2_i32 : i32
      %65 = arith.extui %64 : i1 to i32
      %c0_i32_27 = arith.constant 0 : i32
      %66 = arith.cmpi ne, %65, %c0_i32_27 : i32
      scf.if %66 {
        %c0_28 = arith.constant 0 : index
        %c0_29 = arith.constant 0 : index
        %67 = vector.load %arg15[%c0_28, %c0_29] : memref<2x1024xf32, #tpu.memory_space<vmem>>, vector<1x1024xf32>
        %68 = vector.broadcast %67 : vector<1x1024xf32> to vector<8x1024xf32>
        %69 = arith.mulf %60, %68 : vector<8x1024xf32>
        %c1_30 = arith.constant 1 : index
        %c0_31 = arith.constant 0 : index
        %70 = vector.load %arg15[%c1_30, %c0_31] : memref<2x1024xf32, #tpu.memory_space<vmem>>, vector<1x1024xf32>
        %71 = vector.broadcast %70 : vector<1x1024xf32> to vector<8x1024xf32>
        %72 = arith.addf %69, %71 : vector<8x1024xf32>
        %73 = arith.truncf %72 : vector<8x1024xf32> to vector<8x1024xbf16>
        %c0_32 = arith.constant 0 : index
        %c0_33 = arith.constant 0 : index
        %74 = vector.load %arg11[%c0_32, %c0_33] : memref<1024x8xbf16, #tpu.memory_space<vmem>>, vector<1024x8xbf16>
        %cst_34 = arith.constant dense<0.000000e+00> : vector<8x8xf32>
        %75 = tpu.matmul %73, %74, %cst_34 {dimension_numbers = #tpu.dot_dimension_numbers<[1], [0], [0], [1], [0, 0, 1, 1], [], []>} : vector<8x1024xbf16>, vector<1024x8xbf16>, vector<8x8xf32> -> vector<8x8xf32>
        %c0_35 = arith.constant 0 : index
        %c0_36 = arith.constant 0 : index
        %76 = vector.load %arg12[%c0_35, %c0_36] : memref<1x8xf32, #tpu.memory_space<vmem>>, vector<1x8xf32>
        %77 = vector.broadcast %76 : vector<1x8xf32> to vector<8x8xf32>
        %78 = arith.addf %75, %77 : vector<8x8xf32>
        %cst_37 = arith.constant 0.000000e+00 : f32
        %79 = vector.broadcast %cst_37 : f32 to vector<8x8xf32>
        %80 = arith.maximumf %78, %79 : vector<8x8xf32>
        %c0_38 = arith.constant 0 : index
        %c0_39 = arith.constant 0 : index
        %81 = vector.load %arg13[%c0_38, %c0_39] : memref<8x8xf32, #tpu.memory_space<vmem>>, vector<8x8xf32>
        tpu.vector_store %arg13[%c0_38, %c0_39], %80 {strides = array<i32>} : memref<8x8xf32, #tpu.memory_space<vmem>>, vector<8x8xf32>,
      } else {
      }
    } else {
    }
    %c1_i32_13 = arith.constant 1 : i32
    %42 = arith.cmpi eq, %arg0, %c1_i32_13 : i32
    %c0_i32_14 = arith.constant 0 : i32
    %43 = arith.cmpi eq, %arg1, %c0_i32_14 : i32
    %44 = arith.andi %42, %43 : i1
    %45 = arith.extui %44 : i1 to i32
    %c0_i32_15 = arith.constant 0 : i32
    %46 = arith.cmpi ne, %45, %c0_i32_15 : i32
    scf.if %46 {
      %c0_16 = arith.constant 0 : index
      %c0_17 = arith.constant 0 : index
      %47 = vector.load %arg15[%c0_16, %c0_17] : memref<2x1024xf32, #tpu.memory_space<vmem>>, vector<1x1024xf32>
      %c1 = arith.constant 1 : index
      %c0_18 = arith.constant 0 : index
      %48 = vector.load %arg15[%c1, %c0_18] : memref<2x1024xf32, #tpu.memory_space<vmem>>, vector<1x1024xf32>
      %cst_19 = arith.constant 1.250000e-01 : f32
      %49 = vector.broadcast %cst_19 : f32 to vector<1x1024xf32>
      %50 = arith.mulf %48, %49 : vector<1x1024xf32>
      %cst_20 = arith.constant 0.000000e+00 : f32
      %51 = vector.broadcast %cst_20 : f32 to vector<1x1024xf32>
      %52 = arith.maximumf %50, %51 : vector<1x1024xf32>
      %c0_21 = arith.constant 0 : index
      %c0_22 = arith.constant 0 : index
      %53 = vector.load %arg9[%c0_21, %c0_22] : memref<1x1024xf32, #tpu.memory_space<vmem>>, vector<1x1024xf32>
      %cst_23 = arith.constant 9.99999974E-6 : f32
      %54 = vector.broadcast %cst_23 : f32 to vector<1x1024xf32>
      %55 = arith.addf %52, %54 : vector<1x1024xf32>
      %56 = math.rsqrt %55 : vector<1x1024xf32>
      %57 = arith.mulf %53, %56 : vector<1x1024xf32>
      %c0_24 = arith.constant 0 : index
      %c0_25 = arith.constant 0 : index
      %58 = vector.load %arg10[%c0_24, %c0_25] : memref<1x1024xf32, #tpu.memory_space<vmem>>, vector<1x1024xf32>
      %59 = arith.mulf %57, %47 : vector<1x1024xf32>
      %60 = arith.subf %58, %59 : vector<1x1024xf32>
      %c1_26 = arith.constant 1 : index
      %c0_27 = arith.constant 0 : index
      %61 = vector.load %arg15[%c1_26, %c0_27] : memref<2x1024xf32, #tpu.memory_space<vmem>>, vector<1x1024xf32>
      tpu.vector_store %arg15[%c1_26, %c0_27], %60 {strides = array<i32>} : memref<2x1024xf32, #tpu.memory_space<vmem>>, vector<1x1024xf32>,
      %c0_28 = arith.constant 0 : index
      %c0_29 = arith.constant 0 : index
      %62 = vector.load %arg15[%c0_28, %c0_29] : memref<2x1024xf32, #tpu.memory_space<vmem>>, vector<1x1024xf32>
      tpu.vector_store %arg15[%c0_28, %c0_29], %57 {strides = array<i32>} : memref<2x1024xf32, #tpu.memory_space<vmem>>, vector<1x1024xf32>,
    } else {
    }
    return
  }
  func.func @transform_0(%arg0: i32, %arg1: i32) -> (i32, i32) {
    %c0_i32 = arith.constant 0 : i32
    %c0_i32_0 = arith.constant 0 : i32
    return %arg1, %c0_i32 : i32, i32
  }
  func.func @transform_1(%arg0: i32, %arg1: i32) -> (i32, i32) {
    %c0_i32 = arith.constant 0 : i32
    %c0_i32_0 = arith.constant 0 : i32
    %c0_i32_1 = arith.constant 0 : i32
    return %c0_i32, %c0_i32_0 : i32, i32
  }
  func.func @transform_2(%arg0: i32, %arg1: i32) -> (i32, i32) {
    %c0_i32 = arith.constant 0 : i32
    %c0_i32_0 = arith.constant 0 : i32
    %c0_i32_1 = arith.constant 0 : i32
    return %c0_i32, %c0_i32_0 : i32, i32
  }
  func.func @transform_3(%arg0: i32, %arg1: i32) -> (i32, i32) {
    %c0_i32 = arith.constant 0 : i32
    %c0_i32_0 = arith.constant 0 : i32
    %c0_i32_1 = arith.constant 0 : i32
    return %c0_i32, %c0_i32_0 : i32, i32
  }
  func.func @transform_4(%arg0: i32, %arg1: i32) -> (i32, i32) {
    %c0_i32 = arith.constant 0 : i32
    %c0_i32_0 = arith.constant 0 : i32
    %c0_i32_1 = arith.constant 0 : i32
    return %c0_i32, %c0_i32_0 : i32, i32
  }
  func.func @transform_5(%arg0: i32, %arg1: i32) -> (i32, i32) {
    %c0_i32 = arith.constant 0 : i32
    %c0_i32_0 = arith.constant 0 : i32
    %c0_i32_1 = arith.constant 0 : i32
    return %c0_i32, %c0_i32_0 : i32, i32
  }
  func.func @transform_6(%arg0: i32, %arg1: i32) -> (i32, i32) {
    %c0_i32 = arith.constant 0 : i32
    %c0_i32_0 = arith.constant 0 : i32
    %c0_i32_1 = arith.constant 0 : i32
    return %c0_i32, %c0_i32_0 : i32, i32
  }
  func.func @transform_7(%arg0: i32, %arg1: i32) -> (i32, i32) {
    %c0_i32 = arith.constant 0 : i32
    %c0_i32_0 = arith.constant 0 : i32
    %c0_i32_1 = arith.constant 0 : i32
    return %c0_i32, %c0_i32_0 : i32, i32
  }
  func.func @transform_8(%arg0: i32, %arg1: i32) -> (i32, i32) {
    %c0_i32 = arith.constant 0 : i32
    %c0_i32_0 = arith.constant 0 : i32
    %c0_i32_1 = arith.constant 0 : i32
    return %c0_i32, %c0_i32_0 : i32, i32
  }
  func.func @transform_9(%arg0: i32, %arg1: i32) -> (i32, i32) {
    %c0_i32 = arith.constant 0 : i32
    %c0_i32_0 = arith.constant 0 : i32
    %c0_i32_1 = arith.constant 0 : i32
    return %c0_i32, %c0_i32_0 : i32, i32
  }
  func.func @transform_10(%arg0: i32, %arg1: i32) -> (i32, i32) {
    %c0_i32 = arith.constant 0 : i32
    %c0_i32_0 = arith.constant 0 : i32
    %c0_i32_1 = arith.constant 0 : i32
    return %c0_i32, %c0_i32_0 : i32, i32
  }
  func.func @transform_11(%arg0: i32, %arg1: i32) -> (i32, i32) {
    %c2_i32 = arith.constant 2 : i32
    %0 = arith.cmpi eq, %arg0, %c2_i32 : i32
    %c0_i32 = arith.constant 0 : i32
    %1 = arith.select %0, %arg1, %c0_i32 : i32
    %c0_i32_0 = arith.constant 0 : i32
    %c0_i32_1 = arith.constant 0 : i32
    return %1, %c0_i32_0 : i32, i32
  }
}

</mosaic_0001>

<bundles_post_ra>
// kernel: tpu_custom_call.1
= control target key start
LH: loop header
LB: loop body
LE: loop exit
PB: predicated region body
PF: predicated region fallthrough
CT: control target
= control target key end

     0   :  { %16 = vsyncpa [#allocation5], 0  ;;  %s3555_s0 = inlined_call_operand.vmem [shape: f32[8,3], index: 0, kind: input, shape index: {}]   ;;  %s3556_s1 = inlined_call_operand.vmem [shape: f32[3,128], index: 1, kind: input, shape index: {}]   ;;  %s3557_s2 = inlined_call_operand.vmem [shape: f32[1,128], index: 2, kind: input, shape index: {}]   ;;  %s3558_s3 = inlined_call_operand.vmem [shape: f32[1,128], index: 3, kind: input, shape index: {}]   ;;  %s3559_s4 = inlined_call_operand.vmem [shape: f32[1,128], index: 4, kind: input, shape index: {}]   ;;  %s3560_s5 = inlined_call_operand.vmem [shape: bf16[128,1024], index: 5, kind: input, shape index: {}]   ;;  %s3561_s6 = inlined_call_operand.vmem [shape: f32[1,1024], index: 6, kind: input, shape index: {}]   ;;  %s3562_s7 = inlined_call_operand.vmem [shape: f32[1,1024], index: 7, kind: input, shape index: {}]   ;;  %s3563_s8 = inlined_call_operand.vmem [shape: f32[1,1024], index: 8, kind: input, shape index: {}]   ;;  %s3564_s9 = inlined_call_operand.vmem [shape: bf16[1024,8], index: 9, kind: input, shape index: {}]   ;;  %s3565_s10 = inlined_call_operand.vmem [shape: f32[1,8], index: 10, kind: input, shape index: {}]   ;;  %s3566_s11 = inlined_call_operand.hbm [shape: f32[8,8], index: 11, kind: output, shape index: {}]  }
   0x1   :  { %18 = vsyncpa [#allocation5 + $0x1], 0  ;;  %s2887_s17 = smov 0   ;;  %s2889_s18 = smov 0  }
   0x2   :  { %s2891_s19 = smov 0  }
   0x3 LB: > { %s2415_s20 = sadd.s32 4294967295, %s2818_s19   ;;  %s2416_s21 = sadd.s32 4294967294, %s2818_s19   ;;  %s2818_s19 = sphi %s2891_s19, %s24_s19   ;;  %s2814_s18 = sphi %s2889_s18, %s3569_s18   ;;  %s2810_s17 = sphi %s2887_s17, %s3568_s17  }
   0x4   : > { %s36_s22 = sadd.s32 1, %s2814_s18  ;;  %p2419_p0 = scmp.ge.s32.totalorder %s2818_s19, 1 }
   0x5   : > { %p38_p1 = scmp.ge.s32.totalorder %s36_s22, 3  ;;  %p355_p2 = scmp.lt.s32.totalorder %s2818_s19, 4 }
   0x7   : > { %s3571_s22 = smov (%p38_p1, %s36_s22), 0  ;;  %p356_p3 = pnand %p2419_p0, %p355_p2 }
   0x8   : > { %p401_p4 = scmp.eq.s32.totalorder (!%p356_p3), %s2810_s17, 0 }
   0x9   : > { %359 = sbr.rel (%p356_p3) target bundleno = 909 (0x38d), region = 64 }
  0x10   : > { %406 = sbr.rel (!%p401_p4) target bundleno = 23 (0x17), region = 68  ;;  %v2820_v0 = vmov (%p401_p4), 0.0  }
  0x11   : > { %407 = vst [vmem:[#allocation2] sm:$0x3] (%p401_p4), %v2820_v0  ;;  %408 = vst [vmem:[#allocation3] sm:$0xff] (%p401_p4), %v2820_v0 }
  0x12   : > { %409 = vst [vmem:[#allocation3 + $0x8] sm:$0xff] (%p401_p4), %v2820_v0 }
  0x17 PF: > { %v412_v1 = vld [vmem:[%s3555_s0] sm:$0xff]  ;;  %v2821_v2 = vmov 0   ;;  %v2822_v3 = vmov 2   ;;  %v2823_v4 = vmov 1   ;;  %v419_v5 = vlaneseq  ;;  %p2422_p5 = scmp.ne.s32.totalorder %s2810_s17, 0 }
  0x18   : > { %2694 = vset.pattern.permute.xlu0 %v2821_v2  ;;  %2696 = vset.pattern.permute.xlu1 %v2822_v3  ;;  %v413_v10 = vld [vmem:[%s3556_s1] sm:$0x7] }
  0x19   : > { %416 = vperm.xlu0 %2694, %v412_v1   ;;  %435 = vperm.xlu1 %2696, %v412_v1   ;;  %v2915_v6 = vshrl.u32 %v419_v5, 7  ;;  %v2421_v21 = vld [vmem:[%s3557_s2] ss:$0 sm:$0xff]  ;;  %v482_v43 = vld [vmem:[#allocation2 + $0x1] sm:$0x1] (!%p2422_p5) }
  0x1a   : > { %v472_v31 = vld [vmem:[#allocation2] sm:$0x1] (!%p2422_p5) }
  0x1b   : > { %v2918_v7 = vsub.s32 0, %v2915_v6  ;;  %v2921_v8 = vsub.s32 1, %v2915_v6  ;;  %v2924_v9 = vsub.s32 2, %v2915_v6 }
  0x1d   : > { %2695 = vset.pattern.permute.xlu0 %v2823_v4  ;;  %v422_v12 = vrot.slane %v413_v10, %v2918_v7  ;;  %v431_v13 = vrot.slane %v413_v10, %v2921_v8  ;;  %v441_v14 = vrot.slane %v413_v10, %v2924_v9 }
  0x1e   : > { %425 = vperm.xlu0 %2695, %v412_v1  }
  0x22   : > { %2697 = vset.pattern.permute.xlu0 %v2822_v3 }
  0x98   : > { %v417_v11 = vpop.permute.xlu0 %416  ;;  %v436_v15 = vpop.permute.xlu1 %435 }
  0x99   : > { %v423_v17 = vmul.f32 %v422_v12, %v417_v11  ;;  %v442_v19 = vmul.f32 %v441_v14, %v436_v15 }
  0x9d   : > { %v426_v16 = vpop.permute.xlu0 %425 }
  0x9e   : > { %v432_v18 = vmul.f32 %v431_v13, %v426_v16 }
  0xa0   : > { %v433_v20 = vadd.f32 %v432_v18, %v423_v17  ;;  %455 = sbr.rel (%p2422_p5) target bundleno = 203 (0xcb), region = 72 }
  0xa2   : > { %v443_v22 = vadd.f32 %v442_v19, %v433_v20 }
  0xa4   : > { %v451_v23 = vadd.f32 %v2421_v21, %v443_v22 }
  0xa6   : > { %v2935_v24 = vmax.f32 %v451_v23, 0.0 }
  0xa8   : > { %v456_v25 = vrot.slane %v2935_v24, 4 }
  0xaa   : > { %v457_v26 = vadd.f32 %v456_v25, %v2935_v24 }
  0xac   : > { %v458_v27 = vrot.slane %v457_v26, 2 }
  0xae   : > { %v459_v28 = vadd.f32 %v458_v27, %v457_v26 }
  0xb0   : > { %v460_v29 = vrot.slane %v459_v28, 1 }
  0xb2   : > { %v461_v30 = vadd.f32 %v460_v29, %v459_v28 }
  0xb4   : > { %v462_v32 = vmul.f32 0.125, %v461_v30 }
  0xb6   : > { %v463_v33 = vsub.f32 %v2935_v24, %v462_v32  ;;  %v473_v34 = vsub.f32 %v462_v32, %v472_v31 }
  0xb8   : > { %v464_v35 = vmul.f32 %v463_v33, %v463_v33  ;;  %v480_v36 = vadd.f32 %v473_v34, %v472_v31  ;;  %v484_v41 = vmul.f32 %v473_v34, %v473_v34 }
  0xba   : > { %481 = vst [vmem:[#allocation2] sm:$0x1] %v480_v36  ;;  %v465_v37 = vrot.slane %v464_v35, 4  ;;  %v491_v45 = vmul.f32 0.0, %v484_v41 }
  0xbc   : > { %v466_v38 = vadd.f32 %v465_v37, %v464_v35 }
  0xbe   : > { %v467_v39 = vrot.slane %v466_v38, 2 }
  0xc0   : > { %v468_v40 = vadd.f32 %v467_v39, %v466_v38 }
  0xc2   : > { %v469_v42 = vrot.slane %v468_v40, 1 }
  0xc4   : > { %v470_v44 = vadd.f32 %v469_v42, %v468_v40 }
  0xc6   : > { %v483_v46 = vadd.f32 %v482_v43, %v470_v44 }
  0xc8   : > { %v492_v47 = vadd.f32 %v491_v45, %v483_v46 }
  0xca   : > { %493 = vst [vmem:[#allocation2 + $0x1] sm:$0x1] %v492_v47 }
  0xcb PF: > { %495 = sbr.rel (!%p401_p4) target bundleno = 234 (0xea), region = 76  ;;  %v500_v52 = vld [vmem:[%s3558_s3] sm:$0x1] (%p401_p4) }
  0xcc   : > { %v496_v54 = vld [vmem:[#allocation2] sm:$0x1] (%p401_p4) }
  0xcd   : > { %v504_v56 = vld [vmem:[%s3559_s4] sm:$0x1] (%p401_p4) }
  0xd1   : > { %v497_v48 = vld [vmem:[#allocation2 + $0x1] sm:$0x1] (%p401_p4) }
  0xd2   : > { %v498_v49 = vmul.f32 0.125, %v497_v48 }
  0xd4   : > { %v499_v50 = vmax.f32 %v498_v49, 0.0 }
  0xd6   : > { %v501_v51 = vadd.f32 1e-05, %v499_v50 }
  0xd8   : > { %2698 = vrsqrt.f32 %v501_v51 }
  0xe2   : > { %v2699_v53 = vpop.eup %2698 }
  0xe3   : > { %v503_v55 = vmul.f32 %v2699_v53, %v500_v52 }
  0xe5   : > { %v505_v57 = vmul.f32 %v503_v55, %v496_v54  ;;  %508 = vst [vmem:[#allocation2] sm:$0x1] %v503_v55 }
  0xe7   : > { %v506_v58 = vsub.f32 %v504_v56, %v505_v57 }
  0xe9   : > { %507 = vst [vmem:[#allocation2 + $0x1] sm:$0x1] %v506_v58 }
  0xea PF: > { %p2423_p6 = scmp.lt.s32.totalorder %s2810_s17, 1 }
  0xeb   : > { %v526_v59 = vld [vmem:[%s3560_s5] sm:$0xff] (!%p2423_p6)  ;;  %v527_v61 = vld [vmem:[%s3560_s5 + $0x8] sm:$0xff] (!%p2423_p6)  ;;  %v2824_v3 = vmov (!%p2423_p6), 0   ;;  %p2490_p7 = scmp.ne.s32.totalorder (!%p2423_p6), %s2810_s17, 1 }
  0xec   : > { %512 = sbr.rel (%p2423_p6) target bundleno = 860 (0x35c), region = 80  ;;  %v530_v60 = vld [vmem:[%s3560_s5 + $0x20] sm:$0xff] (!%p2423_p6)  ;;  %v531_v63 = vld [vmem:[%s3560_s5 + $0x28] sm:$0xff] (!%p2423_p6)  ;;  %984 = vmatprep.mubr.bf16.mxu0 (!%p2423_p6), %v2824_v3  ;;  %1025 = vmatprep.mubr.bf16.mxu1 (!%p2423_p6), %v2824_v3 }
  0xed   : > { %v2427_v62 = vcombine.high (!%p2423_p6), %v526_v59, %v530_v60  ;;  %v2426_v0 = vcombine.low (!%p2423_p6), %v526_v59, %v530_v60  ;;  %v534_v1 = vld [vmem:[%s3560_s5 + $0x40] sm:$0xff] (!%p2423_p6)  ;;  %v2429_v4 = vcombine.high (!%p2423_p6), %v527_v61, %v531_v63  ;;  %v2428_v5 = vcombine.low (!%p2423_p6), %v527_v61, %v531_v63  ;;  %v535_v11 = vld [vmem:[%s3560_s5 + $0x48] sm:$0xff] (!%p2423_p6) }
  0xee   : > { %v538_v2 = vld [vmem:[%s3560_s5 + $0x60] sm:$0xff] (!%p2423_p6)  ;;  %v539_v12 = vld [vmem:[%s3560_s5 + $0x68] sm:$0xff] (!%p2423_p6) }
  0xef   : > { %v2435_v10 = vcombine.high (!%p2423_p6), %v534_v1, %v538_v2  ;;  %v542_v13 = vld [vmem:[%s3560_s5 + $0x80] sm:$0xff] (!%p2423_p6)  ;;  %952 = vmatprep.subr.bf16.mxu0 (!%p2423_p6), %v2427_v62  ;;  %v2437_v14 = vcombine.high (!%p2423_p6), %v535_v11, %v539_v12  ;;  %v543_v16 = vld [vmem:[%s3560_s5 + $0x88] sm:$0xff] (!%p2423_p6)  ;;  %993 = vmatprep.subr.bf16.mxu1 (!%p2423_p6), %v2429_v4  ;;  %v2434_v18 = vcombine.low (!%p2423_p6), %v534_v1, %v538_v2  ;;  %v528_v2 = vld [vmem:[%s3560_s5 + $0x10] sm:$0xff] (!%p2423_p6) }
  0xf0   : > { %v546_v15 = vld [vmem:[%s3560_s5 + $0xa0] sm:$0xff] (!%p2423_p6)  ;;  %v547_v17 = vld [vmem:[%s3560_s5 + $0xa8] sm:$0xff] (!%p2423_p6)  ;;  %953 = vmatpush1.bf16.msra.mxu0 (!%p2423_p6), %v2426_v0  ;;  %994 = vmatpush1.bf16.msra.mxu1 (!%p2423_p6), %v2428_v5  ;;  %v2436_v19 = vcombine.low (!%p2423_p6), %v535_v11, %v539_v12  ;;  %v532_v4 = vld [vmem:[%s3560_s5 + $0x30] sm:$0xff] (!%p2423_p6) }
  0xf1   : > { %954 = vmatprep.subr.bf16.mxu0 (!%p2423_p6), %v2435_v10  ;;  %v2443_v20 = vcombine.high (!%p2423_p6), %v542_v13, %v546_v15  ;;  %995 = vmatprep.subr.bf16.mxu1 (!%p2423_p6), %v2437_v14  ;;  %v2445_v21 = vcombine.high (!%p2423_p6), %v543_v16, %v547_v17  ;;  %v550_v22 = vld [vmem:[%s3560_s5 + $0xc0] sm:$0xff] (!%p2423_p6)  ;;  %v551_v25 = vld [vmem:[%s3560_s5 + $0xc8] sm:$0xff] (!%p2423_p6)  ;;  %v2442_v27 = vcombine.low (!%p2423_p6), %v542_v13, %v546_v15  ;;  %v533_v10 = vld [vmem:[%s3560_s5 + $0x38] sm:$0xff] (!%p2423_p6) }
  0xf2   : > { %v554_v23 = vld [vmem:[%s3560_s5 + $0xe0] sm:$0xff] (!%p2423_p6)  ;;  %v555_v26 = vld [vmem:[%s3560_s5 + $0xe8] sm:$0xff] (!%p2423_p6)  ;;  %v2444_v28 = vcombine.low (!%p2423_p6), %v543_v16, %v547_v17  ;;  %v2431_v13 = vcombine.high (!%p2423_p6), %v528_v2, %v532_v4  ;;  %v536_v15 = vld [vmem:[%s3560_s5 + $0x50] sm:$0xff] (!%p2423_p6) }
  0xf3   : > { %v2451_v29 = vcombine.high %v550_v22, %v554_v23  ;;  %v2453_v30 = vcombine.high %v551_v25, %v555_v26  ;;  %v558_v31 = vld [vmem:[%s3560_s5 + $0x100] sm:$0xff]  ;;  %v559_v33 = vld [vmem:[%s3560_s5 + $0x108] sm:$0xff]  ;;  %v2450_v35 = vcombine.low %v550_v22, %v554_v23  ;;  %v2452_v36 = vcombine.low %v551_v25, %v555_v26  ;;  %v540_v16 = vld [vmem:[%s3560_s5 + $0x70] sm:$0xff] }
  0xf4   : > { %955 = vmatpush1.bf16.msra.mxu0 %v2434_v18  ;;  %996 = vmatpush1.bf16.msra.mxu1 %v2436_v19  ;;  %v562_v32 = vld [vmem:[%s3560_s5 + $0x120] sm:$0xff]  ;;  %v563_v34 = vld [vmem:[%s3560_s5 + $0x128] sm:$0xff]  ;;  %v537_v18 = vld [vmem:[%s3560_s5 + $0x58] sm:$0xff]  ;;  %v2439_v22 = vcombine.high %v536_v15, %v540_v16 }
  0xf5   : > { %956 = vmatprep.subr.bf16.mxu0 %v2443_v20  ;;  %997 = vmatprep.subr.bf16.mxu1 %v2445_v21  ;;  %v2459_v37 = vcombine.high %v558_v31, %v562_v32  ;;  %v2461_v38 = vcombine.high %v559_v33, %v563_v34  ;;  %v566_v39 = vld [vmem:[%s3560_s5 + $0x140] sm:$0xff]  ;;  %v567_v41 = vld [vmem:[%s3560_s5 + $0x148] sm:$0xff]  ;;  %v2458_v43 = vcombine.low %v558_v31, %v562_v32  ;;  %v541_v19 = vld [vmem:[%s3560_s5 + $0x78] sm:$0xff] }
  0xf6   : > { %v570_v40 = vld [vmem:[%s3560_s5 + $0x160] sm:$0xff]  ;;  %v571_v42 = vld [vmem:[%s3560_s5 + $0x168] sm:$0xff]  ;;  %v2460_v44 = vcombine.low %v559_v33, %v563_v34  ;;  %v2430_v20 = vcombine.low %v528_v2, %v532_v4  ;;  %v2441_v23 = vcombine.high %v537_v18, %v541_v19  ;;  %v544_v25 = vld [vmem:[%s3560_s5 + $0x90] sm:$0xff] }
  0xf7   : > { %v2467_v45 = vcombine.high %v566_v39, %v570_v40  ;;  %v2469_v46 = vcombine.high %v567_v41, %v571_v42  ;;  %v574_v47 = vld [vmem:[%s3560_s5 + $0x180] sm:$0xff]  ;;  %v575_v49 = vld [vmem:[%s3560_s5 + $0x188] sm:$0xff]  ;;  %v2466_v51 = vcombine.low %v566_v39, %v570_v40  ;;  %v2468_v53 = vcombine.low %v567_v41, %v571_v42  ;;  %v548_v26 = vld [vmem:[%s3560_s5 + $0xb0] sm:$0xff] }
  0xf8   : > { %957 = vmatpush1.bf16.msra.mxu0 %v2442_v27  ;;  %998 = vmatpush1.bf16.msra.mxu1 %v2444_v28  ;;  %v578_v48 = vld [vmem:[%s3560_s5 + $0x1a0] sm:$0xff]  ;;  %v579_v50 = vld [vmem:[%s3560_s5 + $0x1a8] sm:$0xff]  ;;  %v545_v27 = vld [vmem:[%s3560_s5 + $0x98] sm:$0xff]  ;;  %v2447_v31 = vcombine.high %v544_v25, %v548_v26 }
  0xf9   : > { %958 = vmatprep.subr.bf16.mxu0 %v2451_v29  ;;  %999 = vmatprep.subr.bf16.mxu1 %v2453_v30  ;;  %v2424_v52 = vld [vmem:[#allocation2] ss:$0 sm:$0xff]  ;;  %v2475_v54 = vcombine.high %v574_v47, %v578_v48  ;;  %v2477_v55 = vcombine.high %v575_v49, %v579_v50  ;;  %v583_v58 = vld [vmem:[%s3560_s5 + $0x1c8] sm:$0xff]  ;;  %v2474_v61 = vcombine.low %v574_v47, %v578_v48  ;;  %v2425_v62 = vld [vmem:[#allocation2 + $0x1] ss:$0 sm:$0xff] }
  0xfa   : > { %v582_v56 = vld [vmem:[%s3560_s5 + $0x1c0] sm:$0xff]  ;;  %v587_v59 = vld [vmem:[%s3560_s5 + $0x1e8] sm:$0xff]  ;;  %v518_v60 = vmul.f32 %v2424_v52, %v2935_v24  ;;  %v2476_v63 = vcombine.low %v575_v49, %v579_v50  ;;  %v529_v24 = vld [vmem:[%s3560_s5 + $0x18] sm:$0xff]  ;;  %v2438_v29 = vcombine.low %v536_v15, %v540_v16  ;;  %v2440_v30 = vcombine.low %v537_v18, %v541_v19 }
  0xfb   : > { %v586_v57 = vld [vmem:[%s3560_s5 + $0x1e0] sm:$0xff]  ;;  %v2485_v1 = vcombine.high %v583_v58, %v587_v59  ;;  %v2484_v12 = vcombine.low %v583_v58, %v587_v59  ;;  %v2433_v14 = vcombine.high %v529_v24, %v533_v10  ;;  %v2432_v21 = vcombine.low %v529_v24, %v533_v10  ;;  %v549_v28 = vld [vmem:[%s3560_s5 + $0xb8] sm:$0xff]  ;;  %v552_v33 = vld [vmem:[%s3560_s5 + $0xd0] sm:$0xff] }
  0xfc   : > { %959 = vmatpush1.bf16.msra.mxu0 %v2450_v35  ;;  %1000 = vmatpush1.bf16.msra.mxu1 %v2452_v36  ;;  %v2483_v0 = vcombine.high %v582_v56, %v586_v57  ;;  %v524_v5 = vadd.f32 %v2425_v62, %v518_v60  ;;  %v2482_v11 = vcombine.low %v582_v56, %v586_v57  ;;  %v556_v34 = vld [vmem:[%s3560_s5 + $0xf0] sm:$0xff]  ;;  %v553_v35 = vld [vmem:[%s3560_s5 + $0xd8] sm:$0xff]  ;;  %v3157_v15 = vsub.s32 3, %v2915_v6 }
  0xfd   : > { %960 = vmatprep.subr.bf16.mxu0 %v2459_v37  ;;  %1001 = vmatprep.subr.bf16.mxu1 %v2461_v38  ;;  %v2449_v32 = vcombine.high %v545_v27, %v549_v28  ;;  %v557_v36 = vld [vmem:[%s3560_s5 + $0xf8] sm:$0xff]  ;;  %v2446_v37 = vcombine.low %v544_v25, %v548_v26  ;;  %v2448_v38 = vcombine.low %v545_v27, %v549_v28  ;;  %v560_v41 = vld [vmem:[%s3560_s5 + $0x110] sm:$0xff] }
  0xfe   : > { %v3067_v17 = vpack.c.bf16 %v524_v5, %v524_v5  ;;  %v2455_v39 = vcombine.high %v552_v33, %v556_v34  ;;  %v2457_v40 = vcombine.high %v553_v35, %v557_v36  ;;  %v564_v42 = vld [vmem:[%s3560_s5 + $0x130] sm:$0xff]  ;;  %v569_v50 = vld [vmem:[%s3560_s5 + $0x158] sm:$0xff] }
  0xff   : > { %v568_v48 = vld [vmem:[%s3560_s5 + $0x150] sm:$0xff]  ;;  %v2462_v52 = vcombine.low %v560_v41, %v564_v42  ;;  %v577_v58 = vld [vmem:[%s3560_s5 + $0x198] sm:$0xff] }
 0x100   : > { %961 = vmatpush1.bf16.msra.mxu0 %v2458_v43  ;;  %1002 = vmatpush1.bf16.msra.mxu1 %v2460_v44  ;;  %v565_v43 = vld [vmem:[%s3560_s5 + $0x138] sm:$0xff]  ;;  %v2454_v44 = vcombine.low %v552_v33, %v556_v34  ;;  %v572_v49 = vld [vmem:[%s3560_s5 + $0x170] sm:$0xff] }
 0x101   : > { %962 = vmatprep.subr.bf16.mxu0 %v2467_v45  ;;  %1003 = vmatprep.subr.bf16.mxu1 %v2469_v46  ;;  %v2456_v45 = vcombine.low %v553_v35, %v557_v36  ;;  %v2463_v46 = vcombine.high %v560_v41, %v564_v42  ;;  %v576_v56 = vld [vmem:[%s3560_s5 + $0x190] sm:$0xff]  ;;  %v581_v59 = vld [vmem:[%s3560_s5 + $0x1b8] sm:$0xff]  ;;  %v2470_v60 = vcombine.low %v568_v48, %v572_v49 }
 0x102   : > { %v580_v57 = vld [vmem:[%s3560_s5 + $0x1b0] sm:$0xff]  ;;  %v585_v2 = vld [vmem:[%s3560_s5 + $0x1d8] sm:$0xff]  ;;  %v2480_v24 = vcombine.low %v577_v58, %v581_v59 }
 0x103   : > { %v2479_v62 = vcombine.high %v576_v56, %v580_v57  ;;  %v589_v4 = vld [vmem:[%s3560_s5 + $0x1f8] sm:$0xff]  ;;  %v2478_v5 = vcombine.low %v576_v56, %v580_v57 }
 0x104   : > { %963 = vmatpush1.bf16.msra.mxu0 %v2466_v51  ;;  %1004 = vmatpush1.bf16.msra.mxu1 %v2468_v53  ;;  %v573_v51 = vld [vmem:[%s3560_s5 + $0x178] sm:$0xff] }
 0x105   : > { %964 = vmatprep.subr.bf16.mxu0 %v2475_v54  ;;  %1005 = vmatprep.subr.bf16.mxu1 %v2477_v55  ;;  %v2471_v54 = vcombine.high %v568_v48, %v572_v49  ;;  %v2473_v55 = vcombine.high %v569_v50, %v573_v51 }
 0x108   : > { %965 = vmatpush1.bf16.msra.mxu0 %v2474_v61  ;;  %1006 = vmatpush1.bf16.msra.mxu1 %v2476_v63  ;;  %v2472_v61 = vcombine.low %v569_v50, %v573_v51  ;;  %v2481_v63 = vcombine.high %v577_v58, %v581_v59 }
 0x109   : > { %966 = vmatprep.subr.bf16.mxu0 %v2483_v0  ;;  %1007 = vmatprep.subr.bf16.mxu1 %v2485_v1  ;;  %v584_v0 = vld [vmem:[%s3560_s5 + $0x1d0] sm:$0xff] }
 0x10a   : > { %v588_v1 = vld [vmem:[%s3560_s5 + $0x1f0] sm:$0xff] }
 0x10b   : > { %v2487_v10 = vcombine.high %v584_v0, %v588_v1 }
 0x10c   : > { %967 = vmatpush1.bf16.msra.mxu0 %v2482_v11  ;;  %1008 = vmatpush1.bf16.msra.mxu1 %v2484_v12  ;;  %v2489_v11 = vcombine.high %v585_v2, %v589_v4  ;;  %v2486_v12 = vcombine.low %v584_v0, %v588_v1 }
 0x10d   : > { %1034 = vmatprep.subr.bf16.mxu0 %v2431_v13  ;;  %1075 = vmatprep.subr.bf16.mxu1 %v2433_v14  ;;  %v2488_v13 = vcombine.low %v585_v2, %v589_v4  ;;  %v590_v14 = vld [vmem:[%s3561_s6] sm:$0xff] }
 0x10e   : > { %v595_v16 = vrot.slane %v590_v14, %v2918_v7  ;;  %v603_v18 = vrot.slane %v590_v14, %v2924_v9  ;;  %v599_v19 = vrot.slane %v590_v14, %v2921_v8 }
 0x10f   : > { %985 = vmatmul.mubr.bf16.vlgmr.msra.gmra.mrb[0].mxu0 %v3067_v17  ;;  %1026 = vmatmul.mubr.bf16.vlgmr.msra.gmra.mrb[0].mxu1 %v3067_v17 }
 0x110   : > { %1035 = vmatpush1.bf16.msra.mxu0 %v2430_v20  ;;  %1076 = vmatpush1.bf16.msra.mxu1 %v2432_v21  ;;  %v607_v20 = vrot.slane %v590_v14, %v3157_v15 }
 0x111   : > { %1036 = vmatprep.subr.bf16.mxu0 %v2439_v22  ;;  %1077 = vmatprep.subr.bf16.mxu1 %v2441_v23 }
 0x112   : > { %1066 = vmatprep.mubr.bf16.mxu0 %v2824_v3  ;;  %1107 = vmatprep.mubr.bf16.mxu1 %v2824_v3  ;;  %v561_v3 = vld [vmem:[%s3560_s5 + $0x118] sm:$0xff] }
 0x113   : > { %v2465_v47 = vcombine.high %v561_v3, %v565_v43  ;;  %v2464_v53 = vcombine.low %v561_v3, %v565_v43 }
 0x114   : > { %1037 = vmatpush1.bf16.msra.mxu0 %v2438_v29  ;;  %1078 = vmatpush1.bf16.msra.mxu1 %v2440_v30 }
 0x115   : > { %1038 = vmatprep.subr.bf16.mxu0 %v2447_v31  ;;  %1079 = vmatprep.subr.bf16.mxu1 %v2449_v32 }
 0x118   : > { %1039 = vmatpush1.bf16.msra.mxu0 %v2446_v37  ;;  %1080 = vmatpush1.bf16.msra.mxu1 %v2448_v38  ;;  %v3172_v37 = vsub.s32 4, %v2915_v6  ;;  %v3175_v38 = vsub.s32 6, %v2915_v6 }
 0x119   : > { %1040 = vmatprep.subr.bf16.mxu0 %v2455_v39  ;;  %1081 = vmatprep.subr.bf16.mxu1 %v2457_v40  ;;  %v3178_v39 = vsub.s32 5, %v2915_v6  ;;  %v3181_v40 = vsub.s32 7, %v2915_v6 }
 0x11a   : > { %v611_v41 = vrot.slane %v590_v14, %v3172_v37  ;;  %v619_v42 = vrot.slane %v590_v14, %v3175_v38 }
 0x11b   : > { %v615_v3 = vrot.slane %v590_v14, %v3178_v39  ;;  %v623_v43 = vrot.slane %v590_v14, %v3181_v40 }
 0x11c   : > { %1041 = vmatpush1.bf16.msra.mxu0 %v2454_v44  ;;  %1082 = vmatpush1.bf16.msra.mxu1 %v2456_v45 }
 0x11d   : > { %1042 = vmatprep.subr.bf16.mxu0 %v2463_v46  ;;  %1083 = vmatprep.subr.bf16.mxu1 %v2465_v47 }
 0x120   : > { %1043 = vmatpush1.bf16.msra.mxu0 %v2462_v52  ;;  %1084 = vmatpush1.bf16.msra.mxu1 %v2464_v53 }
 0x121   : > { %1044 = vmatprep.subr.bf16.mxu0 %v2471_v54  ;;  %1085 = vmatprep.subr.bf16.mxu1 %v2473_v55 }
 0x124   : > { %1045 = vmatpush1.bf16.msra.mxu0 %v2470_v60  ;;  %1086 = vmatpush1.bf16.msra.mxu1 %v2472_v61 }
 0x125   : > { %1046 = vmatprep.subr.bf16.mxu0 %v2479_v62  ;;  %1087 = vmatprep.subr.bf16.mxu1 %v2481_v63 }
 0x128   : > { %1047 = vmatpush1.bf16.msra.mxu0 %v2478_v5  ;;  %1088 = vmatpush1.bf16.msra.mxu1 %v2480_v24 }
 0x129   : > { %1048 = vmatprep.subr.bf16.mxu0 %v2487_v10  ;;  %1089 = vmatprep.subr.bf16.mxu1 %v2489_v11 }
 0x12c   : > { %1049 = vmatpush1.bf16.msra.mxu0 %v2486_v12  ;;  %1090 = vmatpush1.bf16.msra.mxu1 %v2488_v13 }
 0x12f   : > { %1067 = vmatmul.mubr.bf16.vlgmr.msra.gmra.mrb[4].mxu0 %v3067_v17  ;;  %1108 = vmatmul.mubr.bf16.vlgmr.msra.gmra.mrb[4].mxu1 %v3067_v17 }
 0x1e2   : > { %v986_v21 = vpop.f32.mrb[0].mxu0  ;;  %v1027_v23 = vpop.f32.mrb[0].mxu1 }
 0x1e3   : > { %v987_v22 = vadd.f32 %v986_v21, %v595_v16  ;;  %v988_v25 = vpop.f32.mrb[1].mxu0  ;;  %v1028_v17 = vadd.f32 %v1027_v23, %v603_v18  ;;  %v1029_v27 = vpop.f32.mrb[1].mxu1 }
 0x1e4   : > { %v989_v26 = vadd.f32 %v988_v25, %v599_v19  ;;  %v990_v28 = vpop.f32.mrb[2].mxu0  ;;  %v1030_v30 = vadd.f32 %v1029_v27, %v607_v20  ;;  %v1031_v31 = vpop.f32.mrb[2].mxu1 }
 0x1e5   : > { %v3163_v29 = vmax.f32 %v987_v22, 0.0  ;;  %v991_v32 = vpop.f32.mrb[3].mxu0  ;;  %v3165_v33 = vmax.f32 %v1028_v17, 0.0  ;;  %v1032_v35 = vpop.f32.mrb[3].mxu1 }
 0x1e6   : > { %v3167_v34 = vmax.f32 %v989_v26, 0.0  ;;  %v3169_v36 = vmax.f32 %v1030_v30, 0.0 }
 0x1e7   : > { %v1128_v60 = vrot.slane (!%p2490_p7), %v3163_v29, 4  ;;  %v1140_v62 = vrot.slane (!%p2490_p7), %v3165_v33, 4 }
 0x1e8   : > { %v1134_v61 = vrot.slane (!%p2490_p7), %v3167_v34, 4  ;;  %v1146_v63 = vrot.slane (!%p2490_p7), %v3169_v36, 4 }
 0x1e9   : > { %v1129_v5 = vadd.f32 (!%p2490_p7), %v1128_v60, %v3163_v29  ;;  %v1141_v10 = vadd.f32 (!%p2490_p7), %v1140_v62, %v3165_v33 }
 0x1ea   : > { %v1135_v24 = vadd.f32 (!%p2490_p7), %v1134_v61, %v3167_v34  ;;  %v1147_v11 = vadd.f32 (!%p2490_p7), %v1146_v63, %v3169_v36 }
 0x1eb   : > { %v1130_v18 = vrot.slane (!%p2490_p7), %v1129_v5, 2  ;;  %v1142_v20 = vrot.slane (!%p2490_p7), %v1141_v10, 2 }
 0x1ec   : > { %v1136_v19 = vrot.slane (!%p2490_p7), %v1135_v24, 2  ;;  %v1148_v21 = vrot.slane (!%p2490_p7), %v1147_v11, 2 }
 0x1ed   : > { %v1131_v26 = vadd.f32 (!%p2490_p7), %v1130_v18, %v1129_v5  ;;  %v1143_v28 = vadd.f32 (!%p2490_p7), %v1142_v20, %v1141_v10 }
 0x1ee   : > { %v1137_v27 = vadd.f32 (!%p2490_p7), %v1136_v19, %v1135_v24  ;;  %v1149_v30 = vadd.f32 (!%p2490_p7), %v1148_v21, %v1147_v11 }
 0x200   : > { %1127 = sbr.rel (%p2490_p7) target bundleno = 571 (0x23b), region = 84 }
 0x202   : > { %v1068_v44 = vpop.f32.mrb[4].mxu0  ;;  %v1109_v46 = vpop.f32.mrb[4].mxu1 }
 0x203   : > { %v1069_v45 = vadd.f32 %v1068_v44, %v611_v41  ;;  %v1070_v47 = vpop.f32.mrb[5].mxu0  ;;  %v1110_v48 = vadd.f32 %v1109_v46, %v619_v42  ;;  %v1111_v50 = vpop.f32.mrb[5].mxu1  ;;  %v1132_v42 = vrot.slane (!%p2490_p7), %v1131_v26, 1  ;;  %v1150_v44 = vrot.slane (!%p2490_p7), %v1149_v30, 1 }
 0x204   : > { %v1071_v49 = vadd.f32 %v1070_v47, %v615_v3  ;;  %v1072_v51 = vpop.f32.mrb[6].mxu0  ;;  %v1112_v53 = vadd.f32 %v1111_v50, %v623_v43  ;;  %v1113_v54 = vpop.f32.mrb[6].mxu1  ;;  %v1138_v3 = vrot.slane (!%p2490_p7), %v1137_v27, 1  ;;  %v1144_v43 = vrot.slane (!%p2490_p7), %v1143_v28, 1 }
 0x205   : > { %v3187_v52 = vmax.f32 %v1069_v45, 0.0  ;;  %v1073_v55 = vpop.f32.mrb[7].mxu0  ;;  %v3189_v56 = vmax.f32 %v1110_v48, 0.0  ;;  %v1114_v58 = vpop.f32.mrb[7].mxu1 }
 0x206   : > { %v3191_v57 = vmax.f32 %v1071_v49, 0.0  ;;  %v3193_v59 = vmax.f32 %v1112_v53, 0.0  ;;  %v1133_v49 = vadd.f32 (!%p2490_p7), %v1132_v42, %v1131_v26  ;;  %v1139_v50 = vadd.f32 (!%p2490_p7), %v1138_v3, %v1137_v27 }
 0x207   : > { %v1152_v0 = vrot.slane %v3187_v52, 4  ;;  %v1164_v2 = vrot.slane %v3189_v56, 4  ;;  %v1145_v51 = vadd.f32 %v1144_v43, %v1143_v28  ;;  %v1151_v53 = vadd.f32 %v1150_v44, %v1149_v30 }
 0x208   : > { %v1158_v1 = vrot.slane %v3191_v57, 4  ;;  %v1170_v4 = vrot.slane %v3193_v59, 4  ;;  %v3212_v61 = vmul.f32 0.125, %v1133_v49  ;;  %v3214_v62 = vmul.f32 0.125, %v1139_v50 }
 0x209   : > { %v1153_v12 = vadd.f32 %v1152_v0, %v3187_v52  ;;  %v1165_v14 = vadd.f32 %v1164_v2, %v3189_v56  ;;  %v3216_v63 = vmul.f32 0.125, %v1145_v51  ;;  %v3218_v0 = vmul.f32 0.125, %v1151_v53 }
 0x20a   : > { %v1159_v13 = vadd.f32 %v1158_v1, %v3191_v57  ;;  %v1171_v16 = vadd.f32 %v1170_v4, %v3193_v59  ;;  %v1184_v24 = vsub.f32 %v3163_v29, %v3212_v61  ;;  %v1185_v10 = vsub.f32 %v3167_v34, %v3214_v62 }
 0x20b   : > { %v1154_v22 = vrot.slane %v1153_v12, 2  ;;  %v1166_v25 = vrot.slane %v1165_v14, 2  ;;  %v1186_v11 = vsub.f32 %v3165_v33, %v3216_v63 }
 0x20c   : > { %v1160_v23 = vrot.slane %v1159_v13, 2  ;;  %v1172_v17 = vrot.slane %v1171_v16, 2  ;;  %v1192_v19 = vmul.f32 %v1184_v24, %v1184_v24  ;;  %v1193_v20 = vmul.f32 %v1185_v10, %v1185_v10 }
 0x20d   : > { %v1155_v31 = vadd.f32 %v1154_v22, %v1153_v12  ;;  %v1167_v35 = vadd.f32 %v1166_v25, %v1165_v14  ;;  %v1187_v12 = vsub.f32 %v3169_v36, %v3218_v0  ;;  %v1194_v21 = vmul.f32 %v1186_v11, %v1186_v11 }
 0x20e   : > { %v1161_v32 = vadd.f32 %v1160_v23, %v1159_v13  ;;  %v1173_v41 = vadd.f32 %v1172_v17, %v1171_v16  ;;  %v1200_v27 = vrot.slane %v1192_v19, 4  ;;  %v1206_v28 = vrot.slane %v1193_v20, 4 }
 0x20f   : > { %v1156_v45 = vrot.slane %v1155_v31, 1  ;;  %v1168_v47 = vrot.slane %v1167_v35, 1  ;;  %v1195_v22 = vmul.f32 %v1187_v12, %v1187_v12  ;;  %v1212_v30 = vrot.slane %v1194_v21, 4 }
 0x210   : > { %v1162_v46 = vrot.slane %v1161_v32, 1  ;;  %v1174_v48 = vrot.slane %v1173_v41, 1  ;;  %v1201_v3 = vadd.f32 %v1200_v27, %v1192_v19  ;;  %v1207_v43 = vadd.f32 %v1206_v28, %v1193_v20  ;;  %v3244_v28 = vld [vmem:[#allocation3] ss:$2 sm:$0xff] }
 0x211   : > { %v1157_v54 = vadd.f32 %v1156_v45, %v1155_v31  ;;  %v1169_v58 = vadd.f32 %v1168_v47, %v1167_v35  ;;  %v1218_v31 = vrot.slane %v1195_v22, 4  ;;  %v1213_v44 = vadd.f32 %v1212_v30, %v1194_v21 }
 0x212   : > { %v1163_v55 = vadd.f32 %v1162_v46, %v1161_v32  ;;  %v1175_v60 = vadd.f32 %v1174_v48, %v1173_v41  ;;  %v1202_v50 = vrot.slane %v1201_v3, 2  ;;  %v1208_v51 = vrot.slane %v1207_v43, 2 }
 0x213   : > { %v3220_v1 = vmul.f32 0.125, %v1157_v54  ;;  %v3224_v4 = vmul.f32 0.125, %v1169_v58  ;;  %v1219_v45 = vadd.f32 %v1218_v31, %v1195_v22  ;;  %v1214_v53 = vrot.slane %v1213_v44, 2 }
 0x214   : > { %v3222_v2 = vmul.f32 0.125, %v1163_v55  ;;  %v3226_v5 = vmul.f32 0.125, %v1175_v60  ;;  %v1203_v10 = vadd.f32 %v1202_v50, %v1201_v3  ;;  %v1209_v11 = vadd.f32 %v1208_v51, %v1207_v43 }
 0x215   : > { %v1188_v13 = vsub.f32 %v3187_v52, %v3220_v1  ;;  %v1190_v16 = vsub.f32 %v3189_v56, %v3224_v4  ;;  %v1220_v54 = vrot.slane %v1219_v45, 2  ;;  %v1215_v12 = vadd.f32 %v1214_v53, %v1213_v44 }
 0x216   : > { %v1189_v14 = vsub.f32 %v3191_v57, %v3222_v2  ;;  %v1191_v18 = vsub.f32 %v3193_v59, %v3226_v5  ;;  %v1204_v20 = vrot.slane %v1203_v10, 1  ;;  %v1210_v21 = vrot.slane %v1209_v11, 1 }
 0x217   : > { %v1196_v23 = vmul.f32 %v1188_v13, %v1188_v13  ;;  %v1198_v17 = vmul.f32 %v1190_v16, %v1190_v16  ;;  %v1221_v13 = vadd.f32 %v1220_v54, %v1219_v45  ;;  %v1216_v22 = vrot.slane %v1215_v12, 1 }
 0x218   : > { %v1197_v25 = vmul.f32 %v1189_v14, %v1189_v14  ;;  %v1199_v26 = vmul.f32 %v1191_v18, %v1191_v18  ;;  %v1205_v30 = vadd.f32 %v1204_v20, %v1203_v10  ;;  %v1211_v31 = vadd.f32 %v1210_v21, %v1209_v11 }
 0x219   : > { %v1224_v32 = vrot.slane %v1196_v23, 4  ;;  %v1236_v41 = vrot.slane %v1198_v17, 4  ;;  %v1254_v44 = vrot.slane %v3244_v28, %v2918_v7  ;;  %v1258_v45 = vrot.slane %v3244_v28, %v2921_v8 }
 0x21a   : > { %v1230_v35 = vrot.slane %v1197_v25, 4  ;;  %v1242_v42 = vrot.slane %v1199_v26, 4  ;;  %v1278_v50 = vrot.slane %v3244_v28, %v3175_v38  ;;  %v1282_v51 = vrot.slane %v3244_v28, %v3181_v40 }
 0x21b   : > { %v1225_v46 = vadd.f32 %v1224_v32, %v1196_v23  ;;  %v1237_v48 = vadd.f32 %v1236_v41, %v1198_v17  ;;  %v1222_v23 = vrot.slane %v1221_v13, 1  ;;  %v1217_v32 = vadd.f32 %v1216_v22, %v1215_v12 }
 0x21c   : > { %v1231_v47 = vadd.f32 %v1230_v35, %v1197_v25  ;;  %v1243_v49 = vadd.f32 %v1242_v42, %v1199_v26  ;;  %v1291_v53 = vsub.f32 %v3212_v61, %v1254_v44  ;;  %v1292_v54 = vsub.f32 %v3214_v62, %v1258_v45 }
 0x21d   : > { %v1226_v55 = vrot.slane %v1225_v46, 2  ;;  %v1238_v60 = vrot.slane %v1237_v48, 2  ;;  %v1223_v35 = vadd.f32 %v1222_v23, %v1221_v13  ;;  %v1297_v10 = vsub.f32 %v3224_v4, %v1278_v50 }
 0x21e   : > { %v1232_v58 = vrot.slane %v1231_v47, 2  ;;  %v1244_v24 = vrot.slane %v1243_v49, 2  ;;  %v1298_v11 = vsub.f32 %v3226_v5, %v1282_v51  ;;  %v1320_v12 = vcombine.low %v1291_v53, %v1292_v54 }
 0x21f   : > { %v1227_v14 = vadd.f32 %v1226_v55, %v1225_v46  ;;  %v1239_v18 = vadd.f32 %v1238_v60, %v1237_v48  ;;  %v1262_v46 = vrot.slane %v3244_v28, %v2924_v9  ;;  %v1270_v48 = vrot.slane %v3244_v28, %v3172_v37 }
 0x220   : > { %v1233_v16 = vadd.f32 %v1232_v58, %v1231_v47  ;;  %v1245_v19 = vadd.f32 %v1244_v24, %v1243_v49  ;;  %v1266_v47 = vrot.slane %v3244_v28, %v3157_v15  ;;  %v1274_v49 = vrot.slane %v3244_v28, %v3178_v39 }
 0x221   : > { %v1228_v25 = vrot.slane %v1227_v14, 1  ;;  %v1240_v26 = vrot.slane %v1239_v18, 1  ;;  %v1293_v55 = vsub.f32 %v3216_v63, %v1262_v46  ;;  %v1295_v60 = vsub.f32 %v3220_v1, %v1270_v48 }
 0x222   : > { %v1234_v17 = vrot.slane %v1233_v16, 1  ;;  %v1246_v27 = vrot.slane %v1245_v19, 1  ;;  %v1294_v58 = vsub.f32 %v3218_v0, %v1266_v47  ;;  %v1296_v24 = vsub.f32 %v3222_v2, %v1274_v49 }
 0x223   : > { %v1229_v41 = vadd.f32 %v1228_v25, %v1227_v14  ;;  %v1241_v3 = vadd.f32 %v1240_v26, %v1239_v18  ;;  %v1382_v14 = vcombine.low %v1205_v30, %v1211_v31  ;;  %v1323_v18 = vcombine.low %v1297_v10, %v1298_v11 }
 0x224   : > { %v1235_v42 = vadd.f32 %v1234_v17, %v1233_v16  ;;  %v1247_v43 = vadd.f32 %v1246_v27, %v1245_v19  ;;  %v1321_v13 = vcombine.low %v1293_v55, %v1294_v58  ;;  %v1322_v16 = vcombine.low %v1295_v60, %v1296_v24 }
 0x225   : > { %v2825_v61 = vmov 1966171168   ;;  %v1383_v62 = vcombine.low %v1217_v32, %v1223_v35  ;;  %v1433_v21 = vmul.f32 %v1291_v53, %v1291_v53  ;;  %v1434_v0 = vmul.f32 %v1292_v54, %v1292_v54 }
 0x226   : > { %v1325_v19 = vunpack.c.l.s4 %v2825_v61  ;;  %v1384_v20 = vcombine.low %v1229_v41, %v1235_v42  ;;  %v1385_v63 = vcombine.low %v1241_v3, %v1247_v43  ;;  %v1435_v1 = vmul.f32 %v1293_v55, %v1293_v55 }
 0x227   : > { %v1436_v23 = vmul.f32 %v1294_v58, %v1294_v58  ;;  %v1437_v2 = vmul.f32 %v1295_v60, %v1295_v60  ;;  %v1438_v25 = vmul.f32 %v1296_v24, %v1296_v24  ;;  %v1439_v4 = vmul.f32 %v1297_v10, %v1297_v10 }
 0x228   : > { %v1326_v22 = vunpack.c.0.s8 %v1325_v19  ;;  %v1440_v17 = vmul.f32 %v1298_v11, %v1298_v11  ;;  %v1447_v5 = vmul.f32 0.0, %v1433_v21  ;;  %v1448_v27 = vmul.f32 0.0, %v1434_v0  ;;  %v1373_v19 = vld [vmem:[#allocation3 + $0x1] ss:$2 sm:$0xff] }
 0x229   : > { %v1449_v30 = vmul.f32 0.0, %v1435_v1  ;;  %v1450_v31 = vmul.f32 0.0, %v1436_v23  ;;  %v1451_v44 = vmul.f32 0.0, %v1437_v2  ;;  %v1452_v45 = vmul.f32 0.0, %v1438_v25 }
 0x22a   : > { %v1329_v26 = vsub.s32 %v1326_v22, %v2915_v6  ;;  %v1453_v32 = vmul.f32 0.0, %v1439_v4  ;;  %v1454_v35 = vmul.f32 0.0, %v1440_v17  ;;  %v1463_v53 = vcombine.low %v1447_v5, %v1448_v27 }
 0x22b   : > { %v1464_v54 = vcombine.low %v1449_v30, %v1450_v31  ;;  %v1465_v58 = vcombine.low %v1451_v44, %v1452_v45 }
 0x22c   : > { %v1330_v41 = vrot.slane %v1320_v12, %v1329_v26  ;;  %v1337_v42 = vrot.slane %v1321_v13, %v1329_v26  ;;  %v1344_v3 = vrot.slane %v1322_v16, %v1329_v26  ;;  %v1351_v43 = vrot.slane %v1323_v18, %v1329_v26 }
 0x22d   : > { %v1392_v46 = vrot.slane %v1382_v14, %v1329_v26  ;;  %v1399_v47 = vrot.slane %v1383_v62, %v1329_v26  ;;  %v1406_v48 = vrot.slane %v1384_v20, %v1329_v26  ;;  %v1413_v49 = vrot.slane %v1385_v63, %v1329_v26 }
 0x22e   : > { %v1352_v50 = vcombine.low %v1330_v41, %v1337_v42  ;;  %v1353_v51 = vcombine.low %v1344_v3, %v1351_v43  ;;  %v1466_v60 = vcombine.low %v1453_v32, %v1454_v35  ;;  %v1473_v11 = vrot.slane %v1463_v53, %v1329_v26 }
 0x22f   : > { %v1414_v6 = vcombine.low %v1392_v46, %v1399_v47  ;;  %v1415_v55 = vcombine.low %v1406_v48, %v1413_v49  ;;  %v1480_v61 = vrot.slane %v1464_v54, %v1329_v26  ;;  %v1487_v16 = vrot.slane %v1465_v58, %v1329_v26 }
 0x230   : > { %v1360_v24 = vrot.slane %v1352_v50, %v1329_v26  ;;  %v1367_v10 = vrot.slane %v1353_v51, %v1329_v26  ;;  %v1494_v18 = vrot.slane %v1466_v60, %v1329_v26 }
 0x231   : > { %v1422_v12 = vrot.slane %v1414_v6, %v1329_v26  ;;  %v1429_v13 = vrot.slane %v1415_v55, %v1329_v26  ;;  %v1495_v62 = vcombine.low %v1473_v11, %v1480_v61 }
 0x232   : > { %v1368_v14 = vcombine.low %v1360_v24, %v1367_v10  ;;  %v1496_v63 = vcombine.low %v1487_v16, %v1494_v18 }
 0x233   : > { %v1430_v20 = vcombine.low %v1422_v12, %v1429_v13  ;;  %v1503_v0 = vrot.slane %v1495_v62, %v1329_v26 }
 0x234   : > { %v1370_v21 = vadd.f32 %v1368_v14, %v3244_v28  ;;  %v1510_v1 = vrot.slane %v1496_v63, %v1329_v26 }
 0x235   : > { %v1432_v22 = vadd.f32 %v1430_v20, %v1373_v19 }
 0x236   : > { %1371 = vst [vmem:[#allocation3] ss:$2 sm:$0xff] %v1370_v21  ;;  %v1511_v23 = vcombine.low %v1503_v0, %v1510_v1 }
 0x238   : > { %v1513_v2 = vadd.f32 %v1511_v23, %v1432_v22 }
 0x23a   : > { %1514 = vst [vmem:[#allocation3 + $0x1] ss:$2 sm:$0xff] %v1513_v2 }
 0x23b PF: > { %p2491_p8 = scmp.ne.s32.totalorder %s2810_s17, 2 }
 0x23c   : > { %v2700_v25 = vld [vmem:[%s3564_s9 + $0x40] sm:$0xff] (!%p2491_p8)   ;;  %v2704_v5 = vld [vmem:[%s3564_s9 + $0x48] sm:$0xff] (!%p2491_p8)   ;;  %v2708_v31 = vld [vmem:[%s3564_s9 + $0x50] sm:$0xff] (!%p2491_p8)   ;;  %vm2308_vm0 = vcmask (!%p2491_p8), 64512  }
 0x23d   : > { %1518 = sbr.rel (%p2491_p8) target bundleno = 860 (0x35c), region = 88  ;;  %v2701_v4 = vld [vmem:[%s3564_s9 + $0xc0] sm:$0xff] (!%p2491_p8)   ;;  %2564 = vmatprep.subr.bf16.mxu0 (!%p2491_p8), %v2700_v25  ;;  %v2705_v26 = vld [vmem:[%s3564_s9 + $0xc8] sm:$0xff] (!%p2491_p8)   ;;  %v2709_v44 = vld [vmem:[%s3564_s9 + $0xd0] sm:$0xff] (!%p2491_p8)  }
 0x23e   : > { %v2702_v28 = vld [vmem:[%s3564_s9] sm:$0xff] (!%p2491_p8)   ;;  %2586 = vmatprep.subr.bf16.mxu1 (!%p2491_p8), %v2701_v4  ;;  %v2706_v27 = vld [vmem:[%s3564_s9 + $0x8] sm:$0xff] (!%p2491_p8)   ;;  %v2710_v45 = vld [vmem:[%s3564_s9 + $0x10] sm:$0xff] (!%p2491_p8)  }
 0x23f   : > { %v2703_v17 = vld [vmem:[%s3564_s9 + $0x80] sm:$0xff] (!%p2491_p8)   ;;  %2565 = vmatpush3.bf16.msra.mxu0 (!%p2491_p8), %v2702_v28  ;;  %v2707_v30 = vld [vmem:[%s3564_s9 + $0x88] sm:$0xff] (!%p2491_p8)   ;;  %v2711_v32 = vld [vmem:[%s3564_s9 + $0x90] sm:$0xff] (!%p2491_p8)  }
 0x240   : > { %2587 = vmatpush3.bf16.msra.mxu1 (!%p2491_p8), %v2703_v17  ;;  %2566 = vmatprep.subr.bf16.mxu0 (!%p2491_p8), %v2704_v5  ;;  %v2712_v35 = vld [vmem:[%s3564_s9 + $0x58] sm:$0xff] (!%p2491_p8)   ;;  %v2716_v43 = vld [vmem:[%s3564_s9 + $0x60] sm:$0xff] (!%p2491_p8)   ;;  %v2720_v49 = vld [vmem:[%s3564_s9 + $0x68] sm:$0xff] (!%p2491_p8)  }
 0x241   : > { %2588 = vmatprep.subr.bf16.mxu1 (!%p2491_p8), %v2705_v26  ;;  %v2713_v41 = vld [vmem:[%s3564_s9 + $0xd8] sm:$0xff] (!%p2491_p8)   ;;  %v2717_v46 = vld [vmem:[%s3564_s9 + $0xe0] sm:$0xff] (!%p2491_p8)   ;;  %v2721_v50 = vld [vmem:[%s3564_s9 + $0xe8] sm:$0xff] (!%p2491_p8)  }
 0x242   : > { %v2714_v42 = vld [vmem:[%s3564_s9 + $0x18] sm:$0xff] (!%p2491_p8)   ;;  %v2718_v47 = vld [vmem:[%s3564_s9 + $0x20] sm:$0xff] (!%p2491_p8)   ;;  %v2722_v51 = vld [vmem:[%s3564_s9 + $0x28] sm:$0xff] (!%p2491_p8)  }
 0x243   : > { %2567 = vmatpush3.bf16.msra.mxu0 (!%p2491_p8), %v2706_v27  ;;  %v2715_v3 = vld [vmem:[%s3564_s9 + $0x98] sm:$0xff] (!%p2491_p8)   ;;  %v2719_v48 = vld [vmem:[%s3564_s9 + $0xa0] sm:$0xff] (!%p2491_p8)   ;;  %v2723_v53 = vld [vmem:[%s3564_s9 + $0xa8] sm:$0xff] (!%p2491_p8)  }
 0x244   : > { %2589 = vmatpush3.bf16.msra.mxu1 %v2707_v30  ;;  %2568 = vmatprep.subr.bf16.mxu0 %v2708_v31  ;;  %v2724_v54 = vld [vmem:[%s3564_s9 + $0x70] sm:$0xff]   ;;  %v2728_v60 = vld [vmem:[%s3564_s9 + $0x78] sm:$0xff]   ;;  %v2732_v19 = vld [vmem:[%s3564_s9 + $0x140] sm:$0xff]  }
 0x245   : > { %2590 = vmatprep.subr.bf16.mxu1 %v2709_v44  ;;  %v2725_v6 = vld [vmem:[%s3564_s9 + $0xf0] sm:$0xff]   ;;  %v2729_v24 = vld [vmem:[%s3564_s9 + $0xf8] sm:$0xff]   ;;  %v2734_v25 = vld [vmem:[%s3564_s9 + $0x100] sm:$0xff]  }
 0x246   : > { %v2726_v55 = vld [vmem:[%s3564_s9 + $0x30] sm:$0xff]   ;;  %v2730_v10 = vld [vmem:[%s3564_s9 + $0x38] sm:$0xff]  }
 0x247   : > { %2569 = vmatpush3.bf16.msra.mxu0 %v2710_v45  ;;  %v2727_v58 = vld [vmem:[%s3564_s9 + $0xb0] sm:$0xff]   ;;  %v2731_v11 = vld [vmem:[%s3564_s9 + $0xb8] sm:$0xff]   ;;  %v2739_v45 = vld [vmem:[%s3564_s9 + $0x188] sm:$0xff]  }
 0x248   : > { %2591 = vmatpush3.bf16.msra.mxu1 %v2711_v32  ;;  %2570 = vmatprep.subr.bf16.mxu0 %v2712_v35  ;;  %v3369_v61 = vld [vmem:[#allocation3] ss:$2 sm:$0xff]  ;;  %v3371_v12 = vld [vmem:[#allocation3 + $0x1] ss:$2 sm:$0xff] }
 0x249   : > { %2592 = vmatprep.subr.bf16.mxu1 %v2713_v41  ;;  %v1528_v13 = vrot.slane %v3369_v61, %v2921_v8  ;;  %v1579_v16 = vrot.slane %v3371_v12, %v2921_v8  ;;  %v1536_v18 = vrot.slane %v3369_v61, %v3157_v15  ;;  %v1587_v14 = vrot.slane %v3371_v12, %v3157_v15  ;;  %v2733_v15 = vld [vmem:[%s3564_s9 + $0x1c0] sm:$0xff]   ;;  %v2740_v35 = vld [vmem:[%s3564_s9 + $0x150] sm:$0xff]  }
 0x24a   : > { %v1524_v62 = vrot.slane %v3369_v61, %v2918_v7  ;;  %v1575_v20 = vrot.slane %v3371_v12, %v2918_v7  ;;  %v1532_v63 = vrot.slane %v3369_v61, %v2924_v9  ;;  %v1583_v8 = vrot.slane %v3371_v12, %v2924_v9  ;;  %v2741_v41 = vld [vmem:[%s3564_s9 + $0x1d0] sm:$0xff]  }
 0x24b   : > { %2571 = vmatpush3.bf16.msra.mxu0 %v2714_v42  ;;  %v1562_v21 = vmul.f32 %v1528_v13, %v3167_v34  ;;  %v1564_v0 = vmul.f32 %v1536_v18, %v3169_v36  ;;  %v1544_v22 = vrot.slane %v3369_v61, %v3178_v39  ;;  %v1595_v7 = vrot.slane %v3371_v12, %v3178_v39  ;;  %v2742_v42 = vld [vmem:[%s3564_s9 + $0x110] sm:$0xff]  }
 0x24c   : > { %2593 = vmatpush3.bf16.msra.mxu1 %v2715_v3  ;;  %2572 = vmatprep.subr.bf16.mxu0 %v2716_v43  ;;  %v1561_v1 = vmul.f32 %v1524_v62, %v3163_v29  ;;  %v1563_v23 = vmul.f32 %v1532_v63, %v3165_v33  ;;  %v1552_v9 = vrot.slane %v3369_v61, %v3181_v40  ;;  %v2735_v29 = vld [vmem:[%s3564_s9 + $0x180] sm:$0xff]   ;;  %v2743_v3 = vld [vmem:[%s3564_s9 + $0x190] sm:$0xff]   ;;  %v2744_v43 = vld [vmem:[%s3564_s9 + $0x158] sm:$0xff]  }
 0x24d   : > { %2594 = vmatprep.subr.bf16.mxu1 %v2717_v46  ;;  %v1603_v34 = vrot.slane %v3371_v12, %v3181_v40  ;;  %v1613_v2 = vadd.f32 %v1579_v16, %v1562_v21  ;;  %v1615_v36 = vadd.f32 %v1587_v14, %v1564_v0  ;;  %v1566_v4 = vmul.f32 %v1544_v22, %v3191_v57  ;;  %v2736_v40 = vld [vmem:[%s3564_s9 + $0x148] sm:$0xff]   ;;  %v2745_v46 = vld [vmem:[%s3564_s9 + $0x1d8] sm:$0xff]   ;;  %v2758_v13 = vld [vmem:[%s3564_s9 + $0x130] sm:$0xff]  }
 0x24e   : > { %v1612_v39 = vadd.f32 %v1575_v20, %v1561_v1  ;;  %v1614_v28 = vadd.f32 %v1583_v8, %v1563_v23  ;;  %v1568_v33 = vmul.f32 %v1552_v9, %v3193_v59  ;;  %v2737_v57 = vld [vmem:[%s3564_s9 + $0x1c8] sm:$0xff]   ;;  %v1599_v14 = vrot.slane %v3371_v12, %v3175_v38  ;;  %v2492_v21 = vld [vmem:[%s3565_s10] ss:$0 sm:$0xff] }
 0x24f   : > { %2573 = vmatpush3.bf16.msra.mxu0 %v2718_v47  ;;  %v1621_v17 = vpack.c.bf16 %v1613_v2, %v1613_v2  ;;  %v1623_v5 = vpack.c.bf16 %v1615_v36, %v1615_v36  ;;  %v1617_v26 = vadd.f32 %v1595_v7, %v1566_v4  ;;  %v2738_v59 = vld [vmem:[%s3564_s9 + $0x108] sm:$0xff]   ;;  %v2746_v47 = vld [vmem:[%s3564_s9 + $0x118] sm:$0xff]  }
 0x250   : > { %2595 = vmatpush3.bf16.msra.mxu1 %v2719_v48  ;;  %2574 = vmatprep.subr.bf16.mxu0 %v2720_v49  ;;  %v1620_v27 = vpack.c.bf16 %v1612_v39, %v1612_v39  ;;  %v1622_v30 = vpack.c.bf16 %v1614_v28, %v1614_v28  ;;  %v1619_v31 = vadd.f32 %v1603_v34, %v1568_v33  ;;  %v2747_v48 = vld [vmem:[%s3564_s9 + $0x198] sm:$0xff]   ;;  %v2748_v49 = vld [vmem:[%s3564_s9 + $0x160] sm:$0xff]  }
 0x251   : > { %2596 = vmatprep.subr.bf16.mxu1 %v2721_v50  ;;  %2179 = vmatprep.mubr.bf16.mxu0 %v1621_v17  ;;  %v1625_v44 = vpack.c.bf16 %v1617_v26, %v1617_v26  ;;  %v2749_v50 = vld [vmem:[%s3564_s9 + $0x1e0] sm:$0xff]  }
 0x252   : > { %2219 = vmatprep.mubr.bf16.mxu1 %v1623_v5  ;;  %v1627_v32 = vpack.c.bf16 %v1619_v31, %v1619_v31 }
 0x253   : > { %2575 = vmatpush3.bf16.msra.mxu0 %v2722_v51  ;;  %v2750_v51 = vld [vmem:[%s3564_s9 + $0x120] sm:$0xff]  }
 0x254   : > { %2597 = vmatpush3.bf16.msra.mxu1 %v2723_v53  ;;  %2576 = vmatprep.subr.bf16.mxu0 %v2724_v54  ;;  %v2751_v53 = vld [vmem:[%s3564_s9 + $0x1a0] sm:$0xff]   ;;  %v2752_v54 = vld [vmem:[%s3564_s9 + $0x168] sm:$0xff]  }
 0x255   : > { %2598 = vmatprep.subr.bf16.mxu1 %v2725_v6  ;;  %v2753_v6 = vld [vmem:[%s3564_s9 + $0x1e8] sm:$0xff]  }
 0x257   : > { %2577 = vmatpush3.bf16.msra.mxu0 %v2726_v55  ;;  %v2754_v55 = vld [vmem:[%s3564_s9 + $0x128] sm:$0xff]  }
 0x258   : > { %2599 = vmatpush3.bf16.msra.mxu1 %v2727_v58  ;;  %2578 = vmatprep.subr.bf16.mxu0 %v2728_v60  ;;  %v2755_v58 = vld [vmem:[%s3564_s9 + $0x1a8] sm:$0xff]   ;;  %v1540_v60 = vrot.slane %v3369_v61, %v3172_v37 }
 0x259   : > { %2600 = vmatprep.subr.bf16.mxu1 %v2729_v24  ;;  %v1548_v24 = vrot.slane %v3369_v61, %v3175_v38  ;;  %v1591_v61 = vrot.slane %v3371_v12, %v3172_v37  ;;  %v2761_v37 = vld [vmem:[%s3564_s9 + $0x1f8] sm:$0xff]  }
 0x25a   : > { %v1565_v16 = vmul.f32 %v1540_v60, %v3187_v52  ;;  %v2760_v52 = vld [vmem:[%s3564_s9 + $0x178] sm:$0xff]  }
 0x25b   : > { %2579 = vmatpush3.bf16.msra.mxu0 %v2730_v10  ;;  %v2756_v10 = vld [vmem:[%s3564_s9 + $0x170] sm:$0xff]   ;;  %v1567_v18 = vmul.f32 %v1548_v24, %v3189_v56  ;;  %v2762_v38 = vld [vmem:[%s3564_s9 + $0x138] sm:$0xff]  }
 0x25c   : > { %2601 = vmatpush3.bf16.msra.mxu1 %v2731_v11  ;;  %2608 = vmatprep.subr.bf16.mxu0 %v2732_v19  ;;  %v2757_v11 = vld [vmem:[%s3564_s9 + $0x1f0] sm:$0xff]   ;;  %v1616_v56 = vadd.f32 %v1591_v61, %v1565_v16  ;;  %v2763_v12 = vld [vmem:[%s3564_s9 + $0x1b8] sm:$0xff]  }
 0x25d   : > { %2630 = vmatprep.subr.bf16.mxu1 %v2733_v15  ;;  %v2759_v19 = vld [vmem:[%s3564_s9 + $0x1b0] sm:$0xff]   ;;  %v1618_v62 = vadd.f32 %v1599_v14, %v1567_v18 }
 0x25e   : > { %2180 = vmatmul.mubr.bf16.vlgmr.msra.gmra.mrb[0].mxu0 %v1620_v27  ;;  %v1624_v20 = vpack.c.bf16 %v1616_v56, %v1616_v56 }
 0x25f   : > { %2220 = vmatmul.mubr.bf16.vlgmr.msra.gmra.mrb[0].mxu1 %v1622_v30  ;;  %2609 = vmatpush3.bf16.msra.mxu0 %v2734_v25  ;;  %v1626_v63 = vpack.c.bf16 %v1618_v62, %v1618_v62 }
 0x260   : > { %2631 = vmatpush3.bf16.msra.mxu1 %v2735_v29  ;;  %2610 = vmatprep.subr.bf16.mxu0 %v2736_v40 }
 0x261   : > { %2632 = vmatprep.subr.bf16.mxu1 %v2737_v57  ;;  %2259 = vmatprep.mubr.bf16.mxu0 %v1625_v44 }
 0x262   : > { %2299 = vmatprep.mubr.bf16.mxu1 %v1627_v32 }
 0x263   : > { %2611 = vmatpush3.bf16.msra.mxu0 %v2738_v59 }
 0x264   : > { %2633 = vmatpush3.bf16.msra.mxu1 %v2739_v45  ;;  %2612 = vmatprep.subr.bf16.mxu0 %v2740_v35 }
 0x265   : > { %2634 = vmatprep.subr.bf16.mxu1 %v2741_v41 }
 0x267   : > { %2613 = vmatpush3.bf16.msra.mxu0 %v2742_v42 }
 0x268   : > { %2635 = vmatpush3.bf16.msra.mxu1 %v2743_v3  ;;  %2614 = vmatprep.subr.bf16.mxu0 %v2744_v43 }
 0x269   : > { %2636 = vmatprep.subr.bf16.mxu1 %v2745_v46 }
 0x26b   : > { %2615 = vmatpush3.bf16.msra.mxu0 %v2746_v47 }
 0x26c   : > { %2637 = vmatpush3.bf16.msra.mxu1 %v2747_v48  ;;  %2616 = vmatprep.subr.bf16.mxu0 %v2748_v49 }
 0x26d   : > { %2638 = vmatprep.subr.bf16.mxu1 %v2749_v50 }
 0x26f   : > { %2617 = vmatpush3.bf16.msra.mxu0 %v2750_v51 }
 0x270   : > { %2639 = vmatpush3.bf16.msra.mxu1 %v2751_v53  ;;  %2618 = vmatprep.subr.bf16.mxu0 %v2752_v54 }
 0x271   : > { %2640 = vmatprep.subr.bf16.mxu1 %v2753_v6 }
 0x273   : > { %2619 = vmatpush3.bf16.msra.mxu0 %v2754_v55 }
 0x274   : > { %2641 = vmatpush3.bf16.msra.mxu1 %v2755_v58  ;;  %2620 = vmatprep.subr.bf16.mxu0 %v2756_v10 }
 0x275   : > { %2642 = vmatprep.subr.bf16.mxu1 %v2757_v11 }
 0x277   : > { %2621 = vmatpush3.bf16.msra.mxu0 %v2758_v13 }
 0x278   : > { %2643 = vmatpush3.bf16.msra.mxu1 %v2759_v19  ;;  %2622 = vmatprep.subr.bf16.mxu0 %v2760_v52 }
 0x279   : > { %2644 = vmatprep.subr.bf16.mxu1 %v2761_v37 }
 0x27b   : > { %2623 = vmatpush3.bf16.msra.mxu0 %v2762_v38 }
 0x27c   : > { %2645 = vmatpush3.bf16.msra.mxu1 %v2763_v12 }
 0x27e   : > { %2260 = vmatmul.mubr.bf16.vlgmr.msra.gmra.mrb[4].mxu0 %v1624_v20 }
 0x27f   : > { %2300 = vmatmul.mubr.bf16.vlgmr.msra.gmra.mrb[4].mxu1 %v1626_v63 }
 0x331   : > { %v2580_v8 = vpop.f32.mrb[0].mxu0 }
 0x332   : > { %v2602_v15 = vpop.f32.mrb[0].mxu1  ;;  %v2581_v0 = vpop.f32.mrb[1].mxu0 }
 0x333   : > { %v2603_v22 = vpop.f32.mrb[1].mxu1  ;;  %v2582_v7 = vadd.f32 %v2581_v0, %v2580_v8  ;;  %v2583_v23 = vpop.f32.mrb[2].mxu0 }
 0x334   : > { %v2604_v1 = vadd.f32 %v2603_v22, %v2602_v15  ;;  %v2605_v9 = vpop.f32.mrb[2].mxu1  ;;  %v2584_v34 = vpop.f32.mrb[3].mxu0 }
 0x335   : > { %v2606_v2 = vpop.f32.mrb[3].mxu1  ;;  %v2182_v36 = vadd.f32 %v2582_v7, %v2492_v21 }
 0x337   : > { %v2222_v25 = vadd.f32 %v2604_v1, %v2182_v36 }
 0x351   : > { %v2624_v4 = vpop.f32.mrb[4].mxu0 }
 0x352   : > { %v2646_v39 = vpop.f32.mrb[4].mxu1  ;;  %v2625_v28 = vpop.f32.mrb[5].mxu0 }
 0x353   : > { %v2647_v29 = vpop.f32.mrb[5].mxu1  ;;  %v2626_v33 = vadd.f32 %v2625_v28, %v2624_v4  ;;  %v2627_v5 = vpop.f32.mrb[6].mxu0 }
 0x354   : > { %v2648_v17 = vadd.f32 %v2647_v29, %v2646_v39  ;;  %v2649_v40 = vpop.f32.mrb[6].mxu1  ;;  %v2628_v26 = vpop.f32.mrb[7].mxu0 }
 0x355   : > { %v2650_v27 = vpop.f32.mrb[7].mxu1  ;;  %v2262_v30 = vadd.f32 %v2626_v33, %v2222_v25 }
 0x357   : > { %v2302_v57 = vadd.f32 %v2648_v17, %v2262_v30 }
 0x359   : > { %v2307_v31 = vmax.f32 %v2302_v57, 0.0 }
 0x35b   : > { %2309 = vst.msk [vmem:[#allocation4] sm:$0xff] %vm2308_vm0, %v2307_v31 }
 0x35c PF: > { %p2310_p9 = scmp.eq.s32.totalorder %s2810_s17, 1 }
 0x35d   : > { %v2317_v59 = vld [vmem:[#allocation3 + $0x1] ss:$2 sm:$0xff] (%p2310_p9)  ;;  %v2315_v42 = vld [vmem:[#allocation3] ss:$2 sm:$0xff] (%p2310_p9) }
 0x35e   : > { %2314 = sbr.rel (!%p2310_p9) target bundleno = 886 (0x376), region = 92  ;;  %v2318_v44 = vmul.f32 (%p2310_p9), 0.125, %v2317_v59  ;;  %v2320_v35 = vld [vmem:[%s3562_s7] sm:$0xff] (%p2310_p9) }
 0x35f   : > { %v2324_v43 = vld [vmem:[%s3563_s8] sm:$0xff] (%p2310_p9) }
 0x360   : > { %v2319_v45 = vmax.f32 (%p2310_p9), %v2318_v44, 0.0 }
 0x362   : > { %v2321_v32 = vadd.f32 (%p2310_p9), 1e-05, %v2319_v45 }
 0x364   : > { %2764 = vrsqrt.f32 (%p2310_p9), %v2321_v32 }
 0x36e   : > { %v2765_v41 = vpop.eup %2764 }
 0x36f   : > { %v2323_v3 = vmul.f32 %v2765_v41, %v2320_v35 }
 0x371   : > { %v2325_v46 = vmul.f32 %v2323_v3, %v2315_v42  ;;  %2328 = vst [vmem:[#allocation3] ss:$2 sm:$0xff] %v2323_v3 }
 0x373   : > { %v2326_v47 = vsub.f32 %v2324_v43, %v2325_v46 }
 0x375   : > { %2327 = vst [vmem:[#allocation3 + $0x1] ss:$2 sm:$0xff] %v2326_v47 }
 0x376 PF: > { %p3521_p10 = scmp.eq.s32.totalorder %s2415_s20, 2  ;;  %s2826_s24 = smov [#allocation4]  }
 0x377   : > { %s2345_s25 = sshll.u32 %s2826_s24, 4  ;;  %s2346_s25 = int_to_ptr.vmem [resolvable:$true] %s2345_s25 }
 0x378   : > { %s2766_s26 = scalar_lea.vmem %s2346_s25, 128  ;;  %s2772_s27 = scalar_lea.vmem %s2346_s25, 256 }
 0x379   : > { %p2767_p11 = scmp.ne.s32.totalorder %s2346_s25, %s2766_s26  ;;  %p2773_p0 = scmp.lt.s32.totalorder %s2346_s25, %s2346_s25 }
 0x37a   : > { %p2774_p1 = scmp.lt.s32.totalorder %s2772_s27, %s2766_s26 }
 0x37b   : > { %p2768_p12 = pnand %p2767_p11, %p3521_p10 }
 0x37c   : > { %p2775_p2 = por %p2774_p1, %p2773_p0 }
 0x37d   : > { %p2769_p13 = pneg %p2768_p12 }
 0x37f   : > { %p2776_p3 = pnand %p2775_p2, %p2769_p13 }
 0x381   : > { %2779 = shalt.err (!%p2776_p3)
}
 0x382   : > { %s2780_s29 = scalar_lea.hbm %s3566_s11, 128 }
 0x383   : > { %p2781_p4 = scmp.ne.s32.totalorder %s3566_s11, %s2780_s29  ;;  %p2786_p7 = scmp.lt.u32.totalorder %s2780_s29, %s3566_s11 }
 0x385   : > { %p2782_p5 = pnand %p2781_p4, %p3521_p10 }
 0x387   : > { %p2783_p6 = pneg %p2782_p5 }
 0x389   : > { %p2788_p8 = pnand %p2786_p7, %p2783_p6 }
 0x38b   : > { %2791 = shalt.err (!%p2788_p8)
}
 0x38c   : > { %2653 = dma.vmem_to_hbm [thread:$0]  (%p3521_p10), %s2346_s25, 128, %s3566_s11, [#allocation5]  }
 0x38d PF: > { %p2661_p9 = scmp.ge.s32.totalorder %s2818_s19, 2  ;;  %p2662_p11 = scmp.eq.s32.totalorder %s2416_s21, 2 }
 0x38f   : > { %p2657_p12 = pnand %p2662_p11, %p2661_p9 }
 0x391   : > { %2805 = dma.done.wait (!%p2657_p12), [#allocation5], 128  }
 0x392   : > { %2807 = vsyncadd (!%p2657_p12), [#allocation5], 4294967168  ;;  %s24_s19 = sadd.s32 1, %s2818_s19   ;;  %s3568_s17 = smov %s2814_s18 }
 0x393   : > { %p21_p13 = scmp.ge.s32.totalorder %s24_s19, 5   ;;  %s3569_s18 = smov %s3571_s22 }
 0x395   :  { %23 = sbr.rel (!%p21_p13) target bundleno = 3 (0x3), region = 130 }
 0x39c   :  { %2363 = vsyncpa [#allocation5], 1 }
 0x39d   :  { %2365 = vsyncpa [#allocation5 + $0x1], 1 }

</bundles_post_ra>
